<compile_context>
chip_gen: v7x
topology: tpu7x:2x2x1
jax: 0.10.0
libtpu: 0.0.40
codegen_flags: <defaults>
</compile_context>

<pallas_src>
import functools

import numpy as np
import jax
import jax.numpy as jnp
from jax import lax
from jax.experimental import pallas as pl
from jax.experimental.pallas import tpu as pltpu

# ----------------------------- config ---------------------------------------
VOCAB = 64          # synthetic tokenizer vocabulary (id VOCAB-1 == EOS)
CONTEXT_LEN = 8     # clip.context_length
CLIP_WIDTH = 32     # transformer width
CLIP_HEADS = 4
CLIP_HEAD_DIM = CLIP_WIDTH // CLIP_HEADS
CLIP_EMBED = 32     # clip embedding dim (text/image embedding)
MLP_MULT = 4
TIME_DIM = 16
PRIOR_HIDDEN = 128
PRIOR_STEPS = 4     # prior DDIM sampling steps
DEC_CH = 8          # decoder UNet base channels
DEC_STEPS = 2       # decoder DDIM sampling steps
IMG_C = 3           # output image channels
SUBLANE = 8         # pad tiny row counts up to a full sublane


def _pad_rows(n):
    return max(SUBLANE, ((n + SUBLANE - 1) // SUBLANE) * SUBLANE)


# ----------------------------- in-kernel helpers -----------------------------
def _mxu(a, b):
    """MXU matmul: bf16 operands (no-op cast if already bf16), f32 accum."""
    return jnp.dot(a.astype(jnp.bfloat16), b.astype(jnp.bfloat16),
                   preferred_element_type=jnp.float32)


def _mxu_nt(a, b):
    """a @ b.T (contract last dims of both) without explicit transpose."""
    return lax.dot_general(a.astype(jnp.bfloat16), b.astype(jnp.bfloat16),
                           (((1,), (1,)), ((), ())),
                           preferred_element_type=jnp.float32)


def _layernorm(x, g, b, eps=1e-5):
    mu = jnp.mean(x, axis=-1, keepdims=True)
    var = jnp.mean((x - mu) ** 2, axis=-1, keepdims=True)
    return (x - mu) * lax.rsqrt(var + eps) * g + b


def _silu(x):
    return x * jax.nn.sigmoid(x)


def _l2norm_rows(x, eps=1e-8):
    nrm = jnp.sqrt(jnp.sum(x * x, axis=-1, keepdims=True))
    return x / (nrm + eps)


# -------------------- fused CLIP block + Prior DDIM kernel -------------------
def _clip_prior_kernel(x_ref, mask_ref, pool_ref, mpool_ref,
                       ln1g_ref, ln1b_ref,
                       qkvw_ref, qkvb_ref, aow_ref, aob_ref,
                       ln2g_ref, ln2b_ref,
                       m1w_ref, m1b_ref, m2w_ref, m2b_ref,
                       lnfg_ref, lnfb_ref, tpw_ref, tpb_ref,
                       xp_ref, pte_ref,
                       w1x_ref, w1e_ref, w1p_ref, w1t_ref, b1_ref,
                       w2_ref, b2_ref,
                       emb_ref, *, schedule):
    W = CLIP_WIDTH
    Dh = CLIP_HEAD_DIM
    x = x_ref[...]                                   # (B*L, W) f32
    mask = mask_ref[...]                             # (B*L, B*L) additive mask
    scale = 1.0 / float(np.sqrt(Dh))

    # ---- attention block (pre-LN, block-causal): one fused QKV matmul ----
    h = _layernorm(x, ln1g_ref[...], ln1b_ref[...]).astype(jnp.bfloat16)
    qkv = _mxu(h, qkvw_ref[...]) + qkvb_ref[...]     # (B*L, 3W) f32
    heads = []
    for hd in range(CLIP_HEADS):
        q = qkv[:, 0 * W + hd * Dh: 0 * W + (hd + 1) * Dh]
        k = qkv[:, 1 * W + hd * Dh: 1 * W + (hd + 1) * Dh]
        v = qkv[:, 2 * W + hd * Dh: 2 * W + (hd + 1) * Dh]
        s = _mxu_nt(q, k) * scale + mask
        s = s - jnp.max(s, axis=-1, keepdims=True)
        p = jnp.exp(s)
        p = p * pl.reciprocal(jnp.sum(p, axis=-1, keepdims=True), approx=True)
        heads.append(_mxu(p, v))                     # (B*L, Dh)
    attn = jnp.concatenate(heads, axis=-1)           # (B*L, W)
    x = x + _mxu(attn, aow_ref[...]) + aob_ref[...]  # single full out-proj

    # ---- MLP block ----
    h = _layernorm(x, ln2g_ref[...], ln2b_ref[...]).astype(jnp.bfloat16)
    h = jax.nn.gelu(_mxu(h, m1w_ref[...]) + m1b_ref[...], approximate=True)
    x = x + _mxu(h, m2w_ref[...]) + m2b_ref[...]

    # ---- final LN, EOS pooling, text projection, L2 norm ----
    enc = _layernorm(x, lnfg_ref[...], lnfb_ref[...])   # (B*L, W) encodings
    enc16 = enc.astype(jnp.bfloat16)
    pooled = _mxu(pool_ref[...], enc16)                 # (Bp, W) EOS rows
    txt_emb = _l2norm_rows(_mxu(pooled, tpw_ref[...]) + tpb_ref[...])  # (Bp, E)

    # ---- Prior conditioning, hoisted out of the serial DDIM chain ----
    pooled_enc = _mxu(mpool_ref[...], enc16)            # (Bp, W) mean over L
    cond_h = (_mxu(txt_emb, w1e_ref[...]) + _mxu(pooled_enc, w1p_ref[...])
              + b1_ref[...])                            # (Bp, H)
    t_h = _mxu(pte_ref[...], w1t_ref[...])              # (S, H) per-step part

    # ---- Prior DDIM loop (weights resident in VMEM) ----
    w1x = w1x_ref[...]
    w2 = w2_ref[...]
    b2 = b2_ref[...]
    xt = xp_ref[...]                                    # (Bp, E) f32 noise
    for (t, sa, s1ma, sap, s1map) in schedule:
        hp = jax.nn.gelu(_mxu(xt, w1x) + cond_h + t_h[t:t + 1, :],
                         approximate=True)
        x0 = _mxu(hp, w2) + b2
        eps = (xt - sa * x0) * (1.0 / s1ma)
        xt = sap * x0 + s1map * eps
    emb_ref[...] = _l2norm_rows(xt)


# ----------------------------- fused Decoder sampling kernel -----------------
def _decoder_kernel(x_ref, cond_ref, mask_ref,
                    win_ref, bin_ref, condw_ref, condb_ref,
                    wmid_ref, bmid_ref, wout_ref, bout_ref,
                    o_ref, *, schedule, cf_scale, num_steps, shifts):
    x = x_ref[0]                                        # (IMG_C, HW) f32
    masks = [mask_ref[k] for k in range(9)]             # 9 x (1, HW) f32

    # all (CFG branch, timestep) conditioning channel biases at once
    c_all = _mxu(condw_ref[...], cond_ref[0]) + condb_ref[...]   # (DEC_CH, 2S)

    win, bin_ = win_ref[...], bin_ref[...]
    wmid, bmid = wmid_ref[...], bmid_ref[...]
    wout, bout = wout_ref[...], bout_ref[...]

    def conv3x3(h, w_packed, bias, cout):
        # SAME 3x3 conv: ONE MXU matmul producing all 9 taps, then 9 lane
        # rolls (XLU) + boundary masks (VPU) accumulated in f32.
        y = jnp.dot(w_packed, h.astype(jnp.bfloat16),
                    preferred_element_type=jnp.float32)          # (9*Cout, HW)
        acc = None
        for k in range(9):
            yk = y[k * cout:(k + 1) * cout, :]
            s = shifts[k]
            r = pltpu.roll(yk, shift=s, axis=1) if s else yk
            r = r * masks[k]
            acc = r if acc is None else acc + r
        return acc + bias

    def unet_tail(h0, j):
        h = _silu(h0 + c_all[:, j:j + 1])
        h = _silu(conv3x3(h, wmid, bmid, DEC_CH))
        return conv3x3(h, wout, bout, IMG_C)

    for (t, sa, s1ma, sap, s1map) in schedule:
        h0 = conv3x3(x, win, bin_, DEC_CH)              # shared by CFG branches
        eps_c = unet_tail(h0, t)                        # conditional branch
        if cf_scale is None:
            eps = eps_c
        else:
            eps_u = unet_tail(h0, num_steps + t)        # unconditional branch
            eps = eps_u + cf_scale * (eps_c - eps_u)
        x0 = jnp.clip((x - s1ma * eps) * (1.0 / sa), -1.0, 1.0)
        x = sap * x0 + s1map * eps
    o_ref[0] = x


# ----------------------------- small JAX/host helpers ------------------------
def timestep_embedding(t, dim):
    half = dim // 2
    freqs = jnp.exp(-jnp.log(10000.0) *
                    jnp.arange(half, dtype=jnp.float32) / half)
    args = t * freqs
    return jnp.concatenate([jnp.cos(args), jnp.sin(args)], axis=-1)


def tokenize(texts, context_length):
    """Deterministic synthetic tokenizer (id VOCAB-1 is EOS, like CLIP's argmax)."""
    out = np.zeros((len(texts), context_length), dtype=np.int32)
    for i, s in enumerate(texts):
        ids = [1 + (ord(c) % (VOCAB - 2)) for c in s][: context_length - 1]
        ids = ids + [VOCAB - 1]
        out[i, : len(ids)] = ids
    return jnp.asarray(out)


def _ddim_schedule(num_steps):
    abar = np.cos(np.linspace(0.05, 0.95, num_steps) * (np.pi / 2.0)) ** 2
    sched = []
    for t in reversed(range(num_steps)):
        a_t = float(abar[t])
        a_prev = float(abar[t - 1]) if t > 0 else 1.0
        sched.append((t, float(np.sqrt(a_t)), float(np.sqrt(1.0 - a_t)),
                      float(np.sqrt(a_prev)), float(np.sqrt(1.0 - a_prev))))
    return tuple(sched)


def _build_tap_masks_and_shifts(hw_dim):
    """Per-tap boundary masks (9,1,HW) and lane-roll amounts for a 3x3 SAME conv.

    For tap (di,dj) we want shifted[n] = x[n + di*W + dj] where valid, else 0.
    roll semantics: roll(a, s)[n] = a[n - s]  =>  s = (-(di*W + dj)) % HW.
    """
    HW = hw_dim * hw_dim
    masks = np.zeros((9, 1, HW), np.float32)
    shifts = []
    k = 0
    for di in (-1, 0, 1):
        for dj in (-1, 0, 1):
            m = np.zeros((hw_dim, hw_dim), np.float32)
            m[max(0, -di):hw_dim - max(0, di),
              max(0, -dj):hw_dim - max(0, dj)] = 1.0
            masks[k, 0] = m.reshape(-1)
            shifts.append((-(di * hw_dim + dj)) % HW)
            k += 1
    return masks, tuple(shifts)


def _pack_conv_taps(w):
    """(9, Cin, Cout) tap weights -> (9*Cout, Cin) bf16 for one fused matmul."""
    nine, cin, cout = w.shape
    return jnp.transpose(w, (0, 2, 1)).reshape(nine * cout, cin).astype(jnp.bfloat16)


# ----------------------------- parameters ------------------------------------
def init_params(key):
    ks = jax.random.split(key, 16)

    def nrm(k, shape, scale=0.05):
        return (scale * jax.random.normal(k, shape)).astype(jnp.float32)

    W = CLIP_WIDTH
    p = {}
    # CLIP text encoder (1 transformer block)
    p["tok_emb"] = nrm(ks[0], (VOCAB, W))
    p["pos_emb"] = nrm(ks[1], (CONTEXT_LEN, W))
    p["ln1_g"] = jnp.ones((1, W), jnp.float32)
    p["ln1_b"] = jnp.zeros((1, W), jnp.float32)
    p["qkv_w"] = nrm(ks[2], (W, 3 * W))
    p["qkv_b"] = jnp.zeros((3 * W,), jnp.float32)
    p["attn_out_w"] = nrm(ks[3], (W, W))
    p["attn_out_b"] = jnp.zeros((W,), jnp.float32)
    p["ln2_g"] = jnp.ones((1, W), jnp.float32)
    p["ln2_b"] = jnp.zeros((1, W), jnp.float32)
    p["mlp1_w"] = nrm(ks[4], (W, MLP_MULT * W))
    p["mlp1_b"] = jnp.zeros((MLP_MULT * W,), jnp.float32)
    p["mlp2_w"] = nrm(ks[5], (MLP_MULT * W, W))
    p["mlp2_b"] = jnp.zeros((W,), jnp.float32)
    p["lnf_g"] = jnp.ones((1, W), jnp.float32)
    p["lnf_b"] = jnp.zeros((1, W), jnp.float32)
    p["text_proj_w"] = nrm(ks[6], (W, CLIP_EMBED))
    p["text_proj_b"] = jnp.zeros((CLIP_EMBED,), jnp.float32)
    # Prior denoiser MLP (input = [x_t | text_emb | pooled_enc | t_emb])
    prior_in = CLIP_EMBED + CLIP_EMBED + W + TIME_DIM
    p["prior_w1"] = nrm(ks[7], (prior_in, PRIOR_HIDDEN))
    p["prior_b1"] = jnp.zeros((PRIOR_HIDDEN,), jnp.float32)
    p["prior_w2"] = nrm(ks[8], (PRIOR_HIDDEN, CLIP_EMBED))
    p["prior_b2"] = jnp.zeros((CLIP_EMBED,), jnp.float32)
    # Decoder UNet-lite, 3x3 convs stored per-tap as (9, Cin, Cout)
    p["conv_in_w"] = nrm(ks[9], (9, IMG_C, DEC_CH))
    p["conv_in_b"] = jnp.zeros((DEC_CH,), jnp.float32)
    p["cond_w"] = nrm(ks[10], (CLIP_EMBED + TIME_DIM, DEC_CH))
    p["cond_b"] = jnp.zeros((DEC_CH,), jnp.float32)
    p["conv_mid_w"] = nrm(ks[11], (9, DEC_CH, DEC_CH))
    p["conv_mid_b"] = jnp.zeros((DEC_CH,), jnp.float32)
    p["conv_out_w"] = nrm(ks[12], (9, DEC_CH, IMG_C))
    p["conv_out_b"] = jnp.zeros((IMG_C,), jnp.float32)
    return p


# -------------------- CLIP text encode + Prior sample (one call) -------------
def clip_prior_sample(p, tokens, key):
    B, L = tokens.shape
    W, E = CLIP_WIDTH, CLIP_EMBED
    BL = B * L
    Bp = _pad_rows(B)

    x = (p["tok_emb"][tokens] + p["pos_emb"][None]).reshape(BL, W)
    x = x.astype(jnp.float32)

    # block-causal additive mask: allowed iff same batch AND key <= query
    idx = np.arange(BL)
    same_b = (idx[:, None] // L) == (idx[None, :] // L)
    causal = (idx[None, :] % L) <= (idx[:, None] % L)
    mask = jnp.asarray(np.where(same_b & causal, 0.0, -1e9), jnp.float32)

    # EOS pooling matrix (one-hot rows, padded to a full sublane)
    eos_pos = jnp.argmax(tokens, axis=-1)
    pool = jax.nn.one_hot(jnp.arange(B) * L + eos_pos, BL, dtype=jnp.float32)
    pool = jnp.concatenate([pool, jnp.zeros((Bp - B, BL), jnp.float32)], axis=0)
    pool = pool.astype(jnp.bfloat16)

    # mean-over-sequence pooling matrix for the prior conditioning
    mpool_np = np.zeros((Bp, BL), np.float32)
    for b in range(B):
        mpool_np[b, b * L:(b + 1) * L] = 1.0 / L
    mpool = jnp.asarray(mpool_np, jnp.bfloat16)

    x0 = jnp.pad(jax.random.normal(key, (B, E), dtype=jnp.float32),
                 ((0, Bp - B), (0, 0)))
    pte = jnp.stack([timestep_embedding(float(t), TIME_DIM)
                     for t in range(PRIOR_STEPS)]).astype(jnp.bfloat16)  # (S,T)

    bf = lambda a: a.astype(jnp.bfloat16)
    w1 = p["prior_w1"]
    w1x, w1e = bf(w1[:E]), bf(w1[E:2 * E])
    w1p, w1t = bf(w1[2 * E:2 * E + W]), bf(w1[2 * E + W:])

    vmem = pl.BlockSpec(memory_space=pltpu.MemorySpace.VMEM)
    kernel = functools.partial(_clip_prior_kernel,
                               schedule=_ddim_schedule(PRIOR_STEPS))
    emb_pad = pl.pallas_call(
        kernel,
        out_shape=jax.ShapeDtypeStruct((Bp, E), jnp.float32),
        in_specs=[vmem] * 29,
        out_specs=vmem,
    )(x, mask, pool, mpool,
      p["ln1_g"], p["ln1_b"],
      bf(p["qkv_w"]), p["qkv_b"].reshape(1, -1),
      bf(p["attn_out_w"]), p["attn_out_b"].reshape(1, -1),
      p["ln2_g"], p["ln2_b"],
      bf(p["mlp1_w"]), p["mlp1_b"].reshape(1, -1),
      bf(p["mlp2_w"]), p["mlp2_b"].reshape(1, -1),
      p["lnf_g"], p["lnf_b"],
      bf(p["text_proj_w"]), p["text_proj_b"].reshape(1, -1),
      x0, pte,
      w1x, w1e, w1p, w1t, p["prior_b1"].reshape(1, -1),
      bf(p["prior_w2"]), p["prior_b2"].reshape(1, -1))
    # TODO(synk): the real Prior draws several candidates and re-ranks them by
    # CLIP similarity; a single DDIM chain is sampled here.
    return emb_pad[:B]


# ----------------------------- Decoder.sample_one ----------------------------
def decoder_sample_one(p, image_dim, text_tokens, clip_emb,
                       cf_guidance_scale, key):
    # TODO(synk): text_tokens cross-attention conditioning is not modeled;
    # the decoder conditions on clip_emb (+ time) only.
    del text_tokens
    B, E = clip_emb.shape
    HW = image_dim * image_dim
    S = DEC_STEPS
    CT = E + TIME_DIM

    # lane-dense (C, HW) image layout; output is written NCHW directly.
    x = jax.random.normal(key, (B, IMG_C, image_dim, image_dim),
                          dtype=jnp.float32).reshape(B, IMG_C, HW)

    # per-(branch, timestep) conditioning vectors [clip_emb | t_emb], stored
    # as (B, CT, 2S) so the kernel's single cond matmul is (DEC_CH,CT)@(CT,2S).
    t_embs = jnp.stack([timestep_embedding(float(t), TIME_DIM)
                        for t in range(S)])                        # (S, T)
    cond_c = jnp.concatenate(
        [jnp.broadcast_to(clip_emb[:, None, :], (B, S, E)),
         jnp.broadcast_to(t_embs[None], (B, S, TIME_DIM))], axis=-1)
    cond_u = jnp.concatenate(
        [jnp.zeros((B, S, E), jnp.float32),
         jnp.broadcast_to(t_embs[None], (B, S, TIME_DIM))], axis=-1)
    dec_cond = jnp.transpose(jnp.concatenate([cond_c, cond_u], axis=1),
                             (0, 2, 1))                            # (B, CT, 2S)

    masks_np, shifts = _build_tap_masks_and_shifts(image_dim)
    masks = jnp.asarray(masks_np)                                  # (9, 1, HW)

    win_p = _pack_conv_taps(p["conv_in_w"])      # (9*DEC_CH, IMG_C)
    wmid_p = _pack_conv_taps(p["conv_mid_w"])    # (9*DEC_CH, DEC_CH)
    wout_p = _pack_conv_taps(p["conv_out_w"])    # (9*IMG_C, DEC_CH)
    condw_t = jnp.transpose(p["cond_w"]).astype(jnp.bfloat16)      # (DEC_CH, CT)

    cf = None if cf_guidance_scale is None else float(cf_guidance_scale)
    kernel = functools.partial(_decoder_kernel, schedule=_ddim_schedule(S),
                               cf_scale=cf, num_steps=S, shifts=shifts)
    const3 = lambda b: (0, 0, 0)
    const2 = lambda b: (0, 0)
    out = pl.pallas_call(
        kernel,
        out_shape=jax.ShapeDtypeStruct((B, IMG_C, HW), jnp.float32),
        grid=(B,),
        in_specs=[
            pl.BlockSpec((1, IMG_C, HW), lambda b: (b, 0, 0)),
            pl.BlockSpec((1, CT, 2 * S), lambda b: (b, 0, 0)),
            pl.BlockSpec((9, 1, HW), const3),
            pl.BlockSpec((9 * DEC_CH, IMG_C), const2),
            pl.BlockSpec((DEC_CH, 1), const2),
            pl.BlockSpec((DEC_CH, CT), const2),
            pl.BlockSpec((DEC_CH, 1), const2),
            pl.BlockSpec((9 * DEC_CH, DEC_CH), const2),
            pl.BlockSpec((DEC_CH, 1), const2),
            pl.BlockSpec((9 * IMG_C, DEC_CH), const2),
            pl.BlockSpec((IMG_C, 1), const2),
        ],
        out_specs=pl.BlockSpec((1, IMG_C, HW), lambda b: (b, 0, 0)),
        compiler_params=pltpu.CompilerParams(
            dimension_semantics=("parallel",)),
    )(x, dec_cond, masks,
      win_p, p["conv_in_b"].reshape(DEC_CH, 1),
      condw_t, p["cond_b"].reshape(DEC_CH, 1),
      wmid_p, p["conv_mid_b"].reshape(DEC_CH, 1),
      wout_p, p["conv_out_b"].reshape(IMG_C, 1))

    return out.reshape(B, IMG_C, image_dim, image_dim)   # already NCHW


# ----------------------------- DALLE2.forward --------------------------------
def dalle2_forward(params, image_dim, text, cf_guidance_scale=None):
    text_tokens = tokenize(text, CONTEXT_LEN)
    image_embedding = clip_prior_sample(params, text_tokens,
                                        jax.random.PRNGKey(1))
    return decoder_sample_one(params, image_dim, text_tokens,
                              image_embedding, cf_guidance_scale,
                              jax.random.PRNGKey(2))


# ----------------------------- main -------------------------------------------
if __name__ == "__main__":
    params = init_params(jax.random.PRNGKey(0))
    text = ["a photo of a corgi", "an astronaut riding a horse"]
    image_dim = 16
    out = dalle2_forward(params, image_dim, text, cf_guidance_scale=3.0)
    out = jax.block_until_ready(out)
    assert out.shape == (2, IMG_C, image_dim, image_dim)
    assert bool(jnp.all(jnp.isfinite(out)))
    print("KERNEL_OK")
</pallas_src>

<mosaic_0001>
module attributes {stable_mosaic.version = 11 : i64} {
  func.func @_clip_prior_kernel(%arg0: memref<16x32xf32, #tpu.memory_space<vmem>>, %arg1: memref<16x16xf32, #tpu.memory_space<vmem>>, %arg2: memref<8x16xbf16, #tpu.memory_space<vmem>>, %arg3: memref<8x16xbf16, #tpu.memory_space<vmem>>, %arg4: memref<1x32xf32, #tpu.memory_space<vmem>>, %arg5: memref<1x32xf32, #tpu.memory_space<vmem>>, %arg6: memref<32x96xbf16, #tpu.memory_space<vmem>>, %arg7: memref<1x96xf32, #tpu.memory_space<vmem>>, %arg8: memref<32x32xbf16, #tpu.memory_space<vmem>>, %arg9: memref<1x32xf32, #tpu.memory_space<vmem>>, %arg10: memref<1x32xf32, #tpu.memory_space<vmem>>, %arg11: memref<1x32xf32, #tpu.memory_space<vmem>>, %arg12: memref<32x128xbf16, #tpu.memory_space<vmem>>, %arg13: memref<1x128xf32, #tpu.memory_space<vmem>>, %arg14: memref<128x32xbf16, #tpu.memory_space<vmem>>, %arg15: memref<1x32xf32, #tpu.memory_space<vmem>>, %arg16: memref<1x32xf32, #tpu.memory_space<vmem>>, %arg17: memref<1x32xf32, #tpu.memory_space<vmem>>, %arg18: memref<32x32xbf16, #tpu.memory_space<vmem>>, %arg19: memref<1x32xf32, #tpu.memory_space<vmem>>, %arg20: memref<8x32xf32, #tpu.memory_space<vmem>>, %arg21: memref<4x16xbf16, #tpu.memory_space<vmem>>, %arg22: memref<32x128xbf16, #tpu.memory_space<vmem>>, %arg23: memref<32x128xbf16, #tpu.memory_space<vmem>>, %arg24: memref<32x128xbf16, #tpu.memory_space<vmem>>, %arg25: memref<16x128xbf16, #tpu.memory_space<vmem>>, %arg26: memref<1x128xf32, #tpu.memory_space<vmem>>, %arg27: memref<128x32xbf16, #tpu.memory_space<vmem>>, %arg28: memref<1x32xf32, #tpu.memory_space<vmem>>, %arg29: memref<8x32xf32, #tpu.memory_space<vmem>>) attributes {dimension_semantics = [], scalar_prefetch = 0 : i64, scratch_operands = 0 : i64, tpu.core_type = #tpu.core_type<tc>} {
    %c0 = arith.constant 0 : index
    %c0_0 = arith.constant 0 : index
    %0 = vector.load %arg0[%c0, %c0_0] : memref<16x32xf32, #tpu.memory_space<vmem>>, vector<16x32xf32>
    %c0_1 = arith.constant 0 : index
    %c0_2 = arith.constant 0 : index
    %1 = vector.load %arg1[%c0_1, %c0_2] : memref<16x16xf32, #tpu.memory_space<vmem>>, vector<16x16xf32>
    %c0_3 = arith.constant 0 : index
    %c0_4 = arith.constant 0 : index
    %2 = vector.load %arg4[%c0_3, %c0_4] : memref<1x32xf32, #tpu.memory_space<vmem>>, vector<1x32xf32>
    %c0_5 = arith.constant 0 : index
    %c0_6 = arith.constant 0 : index
    %3 = vector.load %arg5[%c0_5, %c0_6] : memref<1x32xf32, #tpu.memory_space<vmem>>, vector<1x32xf32>
    %cst = arith.constant dense<0.000000e+00> : vector<16xf32>
    %4 = vector.multi_reduction <add>, %0, %cst [1] : vector<16x32xf32> to vector<16xf32>
    %5 = vector.shape_cast %4 : vector<16xf32> to vector<16x1xf32>
    %cst_7 = arith.constant 3.200000e+01 : f32
    %6 = vector.broadcast %cst_7 : f32 to vector<16x1xf32>
    %7 = arith.divf %5, %6 : vector<16x1xf32>
    %8 = vector.broadcast %7 : vector<16x1xf32> to vector<16x32xf32>
    %9 = arith.subf %0, %8 : vector<16x32xf32>
    %10 = arith.mulf %9, %9 : vector<16x32xf32>
    %cst_8 = arith.constant dense<0.000000e+00> : vector<16xf32>
    %11 = vector.multi_reduction <add>, %10, %cst_8 [1] : vector<16x32xf32> to vector<16xf32>
    %12 = vector.shape_cast %11 : vector<16xf32> to vector<16x1xf32>
    %cst_9 = arith.constant 3.200000e+01 : f32
    %13 = vector.broadcast %cst_9 : f32 to vector<16x1xf32>
    %14 = arith.divf %12, %13 : vector<16x1xf32>
    %15 = vector.broadcast %7 : vector<16x1xf32> to vector<16x32xf32>
    %16 = arith.subf %0, %15 : vector<16x32xf32>
    %cst_10 = arith.constant 9.99999974E-6 : f32
    %17 = vector.broadcast %cst_10 : f32 to vector<16x1xf32>
    %18 = arith.addf %14, %17 : vector<16x1xf32>
    %19 = math.rsqrt %18 : vector<16x1xf32>
    %20 = vector.broadcast %19 : vector<16x1xf32> to vector<16x32xf32>
    %21 = arith.mulf %16, %20 : vector<16x32xf32>
    %22 = vector.broadcast %2 : vector<1x32xf32> to vector<16x32xf32>
    %23 = arith.mulf %21, %22 : vector<16x32xf32>
    %24 = vector.broadcast %3 : vector<1x32xf32> to vector<16x32xf32>
    %25 = arith.addf %23, %24 : vector<16x32xf32>
    %26 = arith.truncf %25 : vector<16x32xf32> to vector<16x32xbf16>
    %c0_11 = arith.constant 0 : index
    %c0_12 = arith.constant 0 : index
    %27 = vector.load %arg6[%c0_11, %c0_12] : memref<32x96xbf16, #tpu.memory_space<vmem>>, vector<32x96xbf16>
    %cst_13 = arith.constant dense<0.000000e+00> : vector<16x96xf32>
    %28 = tpu.matmul %26, %27, %cst_13 {dimension_numbers = #tpu.dot_dimension_numbers<[1], [0], [0], [1], [0, 0, 1, 1], [], []>} : vector<16x32xbf16>, vector<32x96xbf16>, vector<16x96xf32> -> vector<16x96xf32>
    %c0_14 = arith.constant 0 : index
    %c0_15 = arith.constant 0 : index
    %29 = vector.load %arg7[%c0_14, %c0_15] : memref<1x96xf32, #tpu.memory_space<vmem>>, vector<1x96xf32>
    %30 = vector.broadcast %29 : vector<1x96xf32> to vector<16x96xf32>
    %31 = arith.addf %28, %30 : vector<16x96xf32>
    %32 = vector.extract_strided_slice %31 {offsets = [0, 0], sizes = [16, 8], strides = [1, 1]} : vector<16x96xf32> to vector<16x8xf32>
    %33 = vector.extract_strided_slice %31 {offsets = [0, 32], sizes = [16, 8], strides = [1, 1]} : vector<16x96xf32> to vector<16x8xf32>
    %34 = vector.extract_strided_slice %31 {offsets = [0, 64], sizes = [16, 8], strides = [1, 1]} : vector<16x96xf32> to vector<16x8xf32>
    %35 = arith.truncf %32 : vector<16x8xf32> to vector<16x8xbf16>
    %36 = arith.truncf %33 : vector<16x8xf32> to vector<16x8xbf16>
    %cst_16 = arith.constant dense<0.000000e+00> : vector<16x16xf32>
    %37 = tpu.matmul %35, %36, %cst_16 {dimension_numbers = #tpu.dot_dimension_numbers<[1], [1], [0], [0], [0, 0, 1, 0], [], []>} : vector<16x8xbf16>, vector<16x8xbf16>, vector<16x16xf32> -> vector<16x16xf32>
    %cst_17 = arith.constant 0.353553385 : f32
    %38 = vector.broadcast %cst_17 : f32 to vector<16x16xf32>
    %39 = arith.mulf %37, %38 : vector<16x16xf32>
    %40 = arith.addf %39, %1 : vector<16x16xf32>
    %cst_18 = arith.constant dense<0xFF800000> : vector<16xf32>
    %41 = vector.multi_reduction <maximumf>, %40, %cst_18 [1] : vector<16x16xf32> to vector<16xf32>
    %42 = vector.shape_cast %41 : vector<16xf32> to vector<16x1xf32>
    %43 = vector.broadcast %42 : vector<16x1xf32> to vector<16x16xf32>
    %44 = arith.subf %40, %43 : vector<16x16xf32>
    %45 = math.exp %44 : vector<16x16xf32>
    %cst_19 = arith.constant dense<0.000000e+00> : vector<16xf32>
    %46 = vector.multi_reduction <add>, %45, %cst_19 [1] : vector<16x16xf32> to vector<16xf32>
    %47 = vector.shape_cast %46 : vector<16xf32> to vector<16x1xf32>
    %48 = tpu.reciprocal %47 {approx = true} : vector<16x1xf32> -> vector<16x1xf32>
    %49 = vector.broadcast %48 : vector<16x1xf32> to vector<16x16xf32>
    %50 = arith.mulf %45, %49 : vector<16x16xf32>
    %51 = arith.truncf %50 : vector<16x16xf32> to vector<16x16xbf16>
    %52 = arith.truncf %34 : vector<16x8xf32> to vector<16x8xbf16>
    %cst_20 = arith.constant dense<0.000000e+00> : vector<16x8xf32>
    %53 = tpu.matmul %51, %52, %cst_20 {dimension_numbers = #tpu.dot_dimension_numbers<[1], [0], [0], [1], [0, 0, 1, 1], [], []>} : vector<16x16xbf16>, vector<16x8xbf16>, vector<16x8xf32> -> vector<16x8xf32>
    %54 = vector.extract_strided_slice %31 {offsets = [0, 8], sizes = [16, 8], strides = [1, 1]} : vector<16x96xf32> to vector<16x8xf32>
    %55 = vector.extract_strided_slice %31 {offsets = [0, 40], sizes = [16, 8], strides = [1, 1]} : vector<16x96xf32> to vector<16x8xf32>
    %56 = vector.extract_strided_slice %31 {offsets = [0, 72], sizes = [16, 8], strides = [1, 1]} : vector<16x96xf32> to vector<16x8xf32>
    %57 = arith.truncf %54 : vector<16x8xf32> to vector<16x8xbf16>
    %58 = arith.truncf %55 : vector<16x8xf32> to vector<16x8xbf16>
    %cst_21 = arith.constant dense<0.000000e+00> : vector<16x16xf32>
    %59 = tpu.matmul %57, %58, %cst_21 {dimension_numbers = #tpu.dot_dimension_numbers<[1], [1], [0], [0], [0, 0, 1, 0], [], []>} : vector<16x8xbf16>, vector<16x8xbf16>, vector<16x16xf32> -> vector<16x16xf32>
    %cst_22 = arith.constant 0.353553385 : f32
    %60 = vector.broadcast %cst_22 : f32 to vector<16x16xf32>
    %61 = arith.mulf %59, %60 : vector<16x16xf32>
    %62 = arith.addf %61, %1 : vector<16x16xf32>
    %cst_23 = arith.constant dense<0xFF800000> : vector<16xf32>
    %63 = vector.multi_reduction <maximumf>, %62, %cst_23 [1] : vector<16x16xf32> to vector<16xf32>
    %64 = vector.shape_cast %63 : vector<16xf32> to vector<16x1xf32>
    %65 = vector.broadcast %64 : vector<16x1xf32> to vector<16x16xf32>
    %66 = arith.subf %62, %65 : vector<16x16xf32>
    %67 = math.exp %66 : vector<16x16xf32>
    %cst_24 = arith.constant dense<0.000000e+00> : vector<16xf32>
    %68 = vector.multi_reduction <add>, %67, %cst_24 [1] : vector<16x16xf32> to vector<16xf32>
    %69 = vector.shape_cast %68 : vector<16xf32> to vector<16x1xf32>
    %70 = tpu.reciprocal %69 {approx = true} : vector<16x1xf32> -> vector<16x1xf32>
    %71 = vector.broadcast %70 : vector<16x1xf32> to vector<16x16xf32>
    %72 = arith.mulf %67, %71 : vector<16x16xf32>
    %73 = arith.truncf %72 : vector<16x16xf32> to vector<16x16xbf16>
    %74 = arith.truncf %56 : vector<16x8xf32> to vector<16x8xbf16>
    %cst_25 = arith.constant dense<0.000000e+00> : vector<16x8xf32>
    %75 = tpu.matmul %73, %74, %cst_25 {dimension_numbers = #tpu.dot_dimension_numbers<[1], [0], [0], [1], [0, 0, 1, 1], [], []>} : vector<16x16xbf16>, vector<16x8xbf16>, vector<16x8xf32> -> vector<16x8xf32>
    %76 = vector.extract_strided_slice %31 {offsets = [0, 16], sizes = [16, 8], strides = [1, 1]} : vector<16x96xf32> to vector<16x8xf32>
    %77 = vector.extract_strided_slice %31 {offsets = [0, 48], sizes = [16, 8], strides = [1, 1]} : vector<16x96xf32> to vector<16x8xf32>
    %78 = vector.extract_strided_slice %31 {offsets = [0, 80], sizes = [16, 8], strides = [1, 1]} : vector<16x96xf32> to vector<16x8xf32>
    %79 = arith.truncf %76 : vector<16x8xf32> to vector<16x8xbf16>
    %80 = arith.truncf %77 : vector<16x8xf32> to vector<16x8xbf16>
    %cst_26 = arith.constant dense<0.000000e+00> : vector<16x16xf32>
    %81 = tpu.matmul %79, %80, %cst_26 {dimension_numbers = #tpu.dot_dimension_numbers<[1], [1], [0], [0], [0, 0, 1, 0], [], []>} : vector<16x8xbf16>, vector<16x8xbf16>, vector<16x16xf32> -> vector<16x16xf32>
    %cst_27 = arith.constant 0.353553385 : f32
    %82 = vector.broadcast %cst_27 : f32 to vector<16x16xf32>
    %83 = arith.mulf %81, %82 : vector<16x16xf32>
    %84 = arith.addf %83, %1 : vector<16x16xf32>
    %cst_28 = arith.constant dense<0xFF800000> : vector<16xf32>
    %85 = vector.multi_reduction <maximumf>, %84, %cst_28 [1] : vector<16x16xf32> to vector<16xf32>
    %86 = vector.shape_cast %85 : vector<16xf32> to vector<16x1xf32>
    %87 = vector.broadcast %86 : vector<16x1xf32> to vector<16x16xf32>
    %88 = arith.subf %84, %87 : vector<16x16xf32>
    %89 = math.exp %88 : vector<16x16xf32>
    %cst_29 = arith.constant dense<0.000000e+00> : vector<16xf32>
    %90 = vector.multi_reduction <add>, %89, %cst_29 [1] : vector<16x16xf32> to vector<16xf32>
    %91 = vector.shape_cast %90 : vector<16xf32> to vector<16x1xf32>
    %92 = tpu.reciprocal %91 {approx = true} : vector<16x1xf32> -> vector<16x1xf32>
    %93 = vector.broadcast %92 : vector<16x1xf32> to vector<16x16xf32>
    %94 = arith.mulf %89, %93 : vector<16x16xf32>
    %95 = arith.truncf %94 : vector<16x16xf32> to vector<16x16xbf16>
    %96 = arith.truncf %78 : vector<16x8xf32> to vector<16x8xbf16>
    %cst_30 = arith.constant dense<0.000000e+00> : vector<16x8xf32>
    %97 = tpu.matmul %95, %96, %cst_30 {dimension_numbers = #tpu.dot_dimension_numbers<[1], [0], [0], [1], [0, 0, 1, 1], [], []>} : vector<16x16xbf16>, vector<16x8xbf16>, vector<16x8xf32> -> vector<16x8xf32>
    %98 = vector.extract_strided_slice %31 {offsets = [0, 24], sizes = [16, 8], strides = [1, 1]} : vector<16x96xf32> to vector<16x8xf32>
    %99 = vector.extract_strided_slice %31 {offsets = [0, 56], sizes = [16, 8], strides = [1, 1]} : vector<16x96xf32> to vector<16x8xf32>
    %100 = vector.extract_strided_slice %31 {offsets = [0, 88], sizes = [16, 8], strides = [1, 1]} : vector<16x96xf32> to vector<16x8xf32>
    %101 = arith.truncf %98 : vector<16x8xf32> to vector<16x8xbf16>
    %102 = arith.truncf %99 : vector<16x8xf32> to vector<16x8xbf16>
    %cst_31 = arith.constant dense<0.000000e+00> : vector<16x16xf32>
    %103 = tpu.matmul %101, %102, %cst_31 {dimension_numbers = #tpu.dot_dimension_numbers<[1], [1], [0], [0], [0, 0, 1, 0], [], []>} : vector<16x8xbf16>, vector<16x8xbf16>, vector<16x16xf32> -> vector<16x16xf32>
    %cst_32 = arith.constant 0.353553385 : f32
    %104 = vector.broadcast %cst_32 : f32 to vector<16x16xf32>
    %105 = arith.mulf %103, %104 : vector<16x16xf32>
    %106 = arith.addf %105, %1 : vector<16x16xf32>
    %cst_33 = arith.constant dense<0xFF800000> : vector<16xf32>
    %107 = vector.multi_reduction <maximumf>, %106, %cst_33 [1] : vector<16x16xf32> to vector<16xf32>
    %108 = vector.shape_cast %107 : vector<16xf32> to vector<16x1xf32>
    %109 = vector.broadcast %108 : vector<16x1xf32> to vector<16x16xf32>
    %110 = arith.subf %106, %109 : vector<16x16xf32>
    %111 = math.exp %110 : vector<16x16xf32>
    %cst_34 = arith.constant dense<0.000000e+00> : vector<16xf32>
    %112 = vector.multi_reduction <add>, %111, %cst_34 [1] : vector<16x16xf32> to vector<16xf32>
    %113 = vector.shape_cast %112 : vector<16xf32> to vector<16x1xf32>
    %114 = tpu.reciprocal %113 {approx = true} : vector<16x1xf32> -> vector<16x1xf32>
    %115 = vector.broadcast %114 : vector<16x1xf32> to vector<16x16xf32>
    %116 = arith.mulf %111, %115 : vector<16x16xf32>
    %117 = arith.truncf %116 : vector<16x16xf32> to vector<16x16xbf16>
    %118 = arith.truncf %100 : vector<16x8xf32> to vector<16x8xbf16>
    %cst_35 = arith.constant dense<0.000000e+00> : vector<16x8xf32>
    %119 = tpu.matmul %117, %118, %cst_35 {dimension_numbers = #tpu.dot_dimension_numbers<[1], [0], [0], [1], [0, 0, 1, 1], [], []>} : vector<16x16xbf16>, vector<16x8xbf16>, vector<16x8xf32> -> vector<16x8xf32>
    %120 = tpu.concatenate %53, %75, %97, %119 in 1 : vector<16x8xf32>, vector<16x8xf32>, vector<16x8xf32>, vector<16x8xf32> -> vector<16x32xf32>
    %c0_36 = arith.constant 0 : index
    %c0_37 = arith.constant 0 : index
    %121 = vector.load %arg8[%c0_36, %c0_37] : memref<32x32xbf16, #tpu.memory_space<vmem>>, vector<32x32xbf16>
    %122 = arith.truncf %120 : vector<16x32xf32> to vector<16x32xbf16>
    %cst_38 = arith.constant dense<0.000000e+00> : vector<16x32xf32>
    %123 = tpu.matmul %122, %121, %cst_38 {dimension_numbers = #tpu.dot_dimension_numbers<[1], [0], [0], [1], [0, 0, 1, 1], [], []>} : vector<16x32xbf16>, vector<32x32xbf16>, vector<16x32xf32> -> vector<16x32xf32>
    %124 = arith.addf %0, %123 : vector<16x32xf32>
    %c0_39 = arith.constant 0 : index
    %c0_40 = arith.constant 0 : index
    %125 = vector.load %arg9[%c0_39, %c0_40] : memref<1x32xf32, #tpu.memory_space<vmem>>, vector<1x32xf32>
    %126 = vector.broadcast %125 : vector<1x32xf32> to vector<16x32xf32>
    %127 = arith.addf %124, %126 : vector<16x32xf32>
    %c0_41 = arith.constant 0 : index
    %c0_42 = arith.constant 0 : index
    %128 = vector.load %arg10[%c0_41, %c0_42] : memref<1x32xf32, #tpu.memory_space<vmem>>, vector<1x32xf32>
    %c0_43 = arith.constant 0 : index
    %c0_44 = arith.constant 0 : index
    %129 = vector.load %arg11[%c0_43, %c0_44] : memref<1x32xf32, #tpu.memory_space<vmem>>, vector<1x32xf32>
    %cst_45 = arith.constant dense<0.000000e+00> : vector<16xf32>
    %130 = vector.multi_reduction <add>, %127, %cst_45 [1] : vector<16x32xf32> to vector<16xf32>
    %131 = vector.shape_cast %130 : vector<16xf32> to vector<16x1xf32>
    %cst_46 = arith.constant 3.200000e+01 : f32
    %132 = vector.broadcast %cst_46 : f32 to vector<16x1xf32>
    %133 = arith.divf %131, %132 : vector<16x1xf32>
    %134 = vector.broadcast %133 : vector<16x1xf32> to vector<16x32xf32>
    %135 = arith.subf %127, %134 : vector<16x32xf32>
    %136 = arith.mulf %135, %135 : vector<16x32xf32>
    %cst_47 = arith.constant dense<0.000000e+00> : vector<16xf32>
    %137 = vector.multi_reduction <add>, %136, %cst_47 [1] : vector<16x32xf32> to vector<16xf32>
    %138 = vector.shape_cast %137 : vector<16xf32> to vector<16x1xf32>
    %cst_48 = arith.constant 3.200000e+01 : f32
    %139 = vector.broadcast %cst_48 : f32 to vector<16x1xf32>
    %140 = arith.divf %138, %139 : vector<16x1xf32>
    %141 = vector.broadcast %133 : vector<16x1xf32> to vector<16x32xf32>
    %142 = arith.subf %127, %141 : vector<16x32xf32>
    %cst_49 = arith.constant 9.99999974E-6 : f32
    %143 = vector.broadcast %cst_49 : f32 to vector<16x1xf32>
    %144 = arith.addf %140, %143 : vector<16x1xf32>
    %145 = math.rsqrt %144 : vector<16x1xf32>
    %146 = vector.broadcast %145 : vector<16x1xf32> to vector<16x32xf32>
    %147 = arith.mulf %142, %146 : vector<16x32xf32>
    %148 = vector.broadcast %128 : vector<1x32xf32> to vector<16x32xf32>
    %149 = arith.mulf %147, %148 : vector<16x32xf32>
    %150 = vector.broadcast %129 : vector<1x32xf32> to vector<16x32xf32>
    %151 = arith.addf %149, %150 : vector<16x32xf32>
    %152 = arith.truncf %151 : vector<16x32xf32> to vector<16x32xbf16>
    %c0_50 = arith.constant 0 : index
    %c0_51 = arith.constant 0 : index
    %153 = vector.load %arg12[%c0_50, %c0_51] : memref<32x128xbf16, #tpu.memory_space<vmem>>, vector<32x128xbf16>
    %cst_52 = arith.constant dense<0.000000e+00> : vector<16x128xf32>
    %154 = tpu.matmul %152, %153, %cst_52 {dimension_numbers = #tpu.dot_dimension_numbers<[1], [0], [0], [1], [0, 0, 1, 1], [], []>} : vector<16x32xbf16>, vector<32x128xbf16>, vector<16x128xf32> -> vector<16x128xf32>
    %c0_53 = arith.constant 0 : index
    %c0_54 = arith.constant 0 : index
    %155 = vector.load %arg13[%c0_53, %c0_54] : memref<1x128xf32, #tpu.memory_space<vmem>>, vector<1x128xf32>
    %156 = vector.broadcast %155 : vector<1x128xf32> to vector<16x128xf32>
    %157 = arith.addf %154, %156 : vector<16x128xf32>
    %158 = arith.mulf %157, %157 : vector<16x128xf32>
    %159 = arith.mulf %157, %158 : vector<16x128xf32>
    %cst_55 = arith.constant 4.471500e-02 : f32
    %160 = vector.broadcast %cst_55 : f32 to vector<16x128xf32>
    %161 = arith.mulf %160, %159 : vector<16x128xf32>
    %162 = arith.addf %157, %161 : vector<16x128xf32>
    %cst_56 = arith.constant 0.797884583 : f32
    %163 = vector.broadcast %cst_56 : f32 to vector<16x128xf32>
    %164 = arith.mulf %163, %162 : vector<16x128xf32>
    %165 = math.tanh %164 : vector<16x128xf32>
    %cst_57 = arith.constant 1.000000e+00 : f32
    %166 = vector.broadcast %cst_57 : f32 to vector<16x128xf32>
    %167 = arith.addf %166, %165 : vector<16x128xf32>
    %cst_58 = arith.constant 5.000000e-01 : f32
    %168 = vector.broadcast %cst_58 : f32 to vector<16x128xf32>
    %169 = arith.mulf %168, %167 : vector<16x128xf32>
    %170 = arith.mulf %157, %169 : vector<16x128xf32>
    %c0_59 = arith.constant 0 : index
    %c0_60 = arith.constant 0 : index
    %171 = vector.load %arg14[%c0_59, %c0_60] : memref<128x32xbf16, #tpu.memory_space<vmem>>, vector<128x32xbf16>
    %172 = arith.truncf %170 : vector<16x128xf32> to vector<16x128xbf16>
    %cst_61 = arith.constant dense<0.000000e+00> : vector<16x32xf32>
    %173 = tpu.matmul %172, %171, %cst_61 {dimension_numbers = #tpu.dot_dimension_numbers<[1], [0], [0], [1], [0, 0, 1, 1], [], []>} : vector<16x128xbf16>, vector<128x32xbf16>, vector<16x32xf32> -> vector<16x32xf32>
    %174 = arith.addf %127, %173 : vector<16x32xf32>
    %c0_62 = arith.constant 0 : index
    %c0_63 = arith.constant 0 : index
    %175 = vector.load %arg15[%c0_62, %c0_63] : memref<1x32xf32, #tpu.memory_space<vmem>>, vector<1x32xf32>
    %176 = vector.broadcast %175 : vector<1x32xf32> to vector<16x32xf32>
    %177 = arith.addf %174, %176 : vector<16x32xf32>
    %c0_64 = arith.constant 0 : index
    %c0_65 = arith.constant 0 : index
    %178 = vector.load %arg16[%c0_64, %c0_65] : memref<1x32xf32, #tpu.memory_space<vmem>>, vector<1x32xf32>
    %c0_66 = arith.constant 0 : index
    %c0_67 = arith.constant 0 : index
    %179 = vector.load %arg17[%c0_66, %c0_67] : memref<1x32xf32, #tpu.memory_space<vmem>>, vector<1x32xf32>
    %cst_68 = arith.constant dense<0.000000e+00> : vector<16xf32>
    %180 = vector.multi_reduction <add>, %177, %cst_68 [1] : vector<16x32xf32> to vector<16xf32>
    %181 = vector.shape_cast %180 : vector<16xf32> to vector<16x1xf32>
    %cst_69 = arith.constant 3.200000e+01 : f32
    %182 = vector.broadcast %cst_69 : f32 to vector<16x1xf32>
    %183 = arith.divf %181, %182 : vector<16x1xf32>
    %184 = vector.broadcast %183 : vector<16x1xf32> to vector<16x32xf32>
    %185 = arith.subf %177, %184 : vector<16x32xf32>
    %186 = arith.mulf %185, %185 : vector<16x32xf32>
    %cst_70 = arith.constant dense<0.000000e+00> : vector<16xf32>
    %187 = vector.multi_reduction <add>, %186, %cst_70 [1] : vector<16x32xf32> to vector<16xf32>
    %188 = vector.shape_cast %187 : vector<16xf32> to vector<16x1xf32>
    %cst_71 = arith.constant 3.200000e+01 : f32
    %189 = vector.broadcast %cst_71 : f32 to vector<16x1xf32>
    %190 = arith.divf %188, %189 : vector<16x1xf32>
    %191 = vector.broadcast %183 : vector<16x1xf32> to vector<16x32xf32>
    %192 = arith.subf %177, %191 : vector<16x32xf32>
    %cst_72 = arith.constant 9.99999974E-6 : f32
    %193 = vector.broadcast %cst_72 : f32 to vector<16x1xf32>
    %194 = arith.addf %190, %193 : vector<16x1xf32>
    %195 = math.rsqrt %194 : vector<16x1xf32>
    %196 = vector.broadcast %195 : vector<16x1xf32> to vector<16x32xf32>
    %197 = arith.mulf %192, %196 : vector<16x32xf32>
    %198 = vector.broadcast %178 : vector<1x32xf32> to vector<16x32xf32>
    %199 = arith.mulf %197, %198 : vector<16x32xf32>
    %200 = vector.broadcast %179 : vector<1x32xf32> to vector<16x32xf32>
    %201 = arith.addf %199, %200 : vector<16x32xf32>
    %202 = arith.truncf %201 : vector<16x32xf32> to vector<16x32xbf16>
    %c0_73 = arith.constant 0 : index
    %c0_74 = arith.constant 0 : index
    %203 = vector.load %arg2[%c0_73, %c0_74] : memref<8x16xbf16, #tpu.memory_space<vmem>>, vector<8x16xbf16>
    %cst_75 = arith.constant dense<0.000000e+00> : vector<8x32xf32>
    %204 = tpu.matmul %203, %202, %cst_75 {dimension_numbers = #tpu.dot_dimension_numbers<[1], [0], [0], [1], [0, 0, 1, 1], [], []>} : vector<8x16xbf16>, vector<16x32xbf16>, vector<8x32xf32> -> vector<8x32xf32>
    %c0_76 = arith.constant 0 : index
    %c0_77 = arith.constant 0 : index
    %205 = vector.load %arg18[%c0_76, %c0_77] : memref<32x32xbf16, #tpu.memory_space<vmem>>, vector<32x32xbf16>
    %206 = arith.truncf %204 : vector<8x32xf32> to vector<8x32xbf16>
    %cst_78 = arith.constant dense<0.000000e+00> : vector<8x32xf32>
    %207 = tpu.matmul %206, %205, %cst_78 {dimension_numbers = #tpu.dot_dimension_numbers<[1], [0], [0], [1], [0, 0, 1, 1], [], []>} : vector<8x32xbf16>, vector<32x32xbf16>, vector<8x32xf32> -> vector<8x32xf32>
    %c0_79 = arith.constant 0 : index
    %c0_80 = arith.constant 0 : index
    %208 = vector.load %arg19[%c0_79, %c0_80] : memref<1x32xf32, #tpu.memory_space<vmem>>, vector<1x32xf32>
    %209 = vector.broadcast %208 : vector<1x32xf32> to vector<8x32xf32>
    %210 = arith.addf %207, %209 : vector<8x32xf32>
    %211 = arith.mulf %210, %210 : vector<8x32xf32>
    %cst_81 = arith.constant dense<0.000000e+00> : vector<8xf32>
    %212 = vector.multi_reduction <add>, %211, %cst_81 [1] : vector<8x32xf32> to vector<8xf32>
    %213 = vector.shape_cast %212 : vector<8xf32> to vector<8x1xf32>
    %214 = math.sqrt %213 : vector<8x1xf32>
    %cst_82 = arith.constant 9.99999993E-9 : f32
    %215 = vector.broadcast %cst_82 : f32 to vector<8x1xf32>
    %216 = arith.addf %214, %215 : vector<8x1xf32>
    %217 = vector.broadcast %216 : vector<8x1xf32> to vector<8x32xf32>
    %218 = arith.divf %210, %217 : vector<8x32xf32>
    %c0_83 = arith.constant 0 : index
    %c0_84 = arith.constant 0 : index
    %219 = vector.load %arg3[%c0_83, %c0_84] : memref<8x16xbf16, #tpu.memory_space<vmem>>, vector<8x16xbf16>
    %cst_85 = arith.constant dense<0.000000e+00> : vector<8x32xf32>
    %220 = tpu.matmul %219, %202, %cst_85 {dimension_numbers = #tpu.dot_dimension_numbers<[1], [0], [0], [1], [0, 0, 1, 1], [], []>} : vector<8x16xbf16>, vector<16x32xbf16>, vector<8x32xf32> -> vector<8x32xf32>
    %c0_86 = arith.constant 0 : index
    %c0_87 = arith.constant 0 : index
    %221 = vector.load %arg23[%c0_86, %c0_87] : memref<32x128xbf16, #tpu.memory_space<vmem>>, vector<32x128xbf16>
    %222 = arith.truncf %218 : vector<8x32xf32> to vector<8x32xbf16>
    %cst_88 = arith.constant dense<0.000000e+00> : vector<8x128xf32>
    %223 = tpu.matmul %222, %221, %cst_88 {dimension_numbers = #tpu.dot_dimension_numbers<[1], [0], [0], [1], [0, 0, 1, 1], [], []>} : vector<8x32xbf16>, vector<32x128xbf16>, vector<8x128xf32> -> vector<8x128xf32>
    %c0_89 = arith.constant 0 : index
    %c0_90 = arith.constant 0 : index
    %224 = vector.load %arg24[%c0_89, %c0_90] : memref<32x128xbf16, #tpu.memory_space<vmem>>, vector<32x128xbf16>
    %225 = arith.truncf %220 : vector<8x32xf32> to vector<8x32xbf16>
    %cst_91 = arith.constant dense<0.000000e+00> : vector<8x128xf32>
    %226 = tpu.matmul %225, %224, %cst_91 {dimension_numbers = #tpu.dot_dimension_numbers<[1], [0], [0], [1], [0, 0, 1, 1], [], []>} : vector<8x32xbf16>, vector<32x128xbf16>, vector<8x128xf32> -> vector<8x128xf32>
    %227 = arith.addf %223, %226 : vector<8x128xf32>
    %c0_92 = arith.constant 0 : index
    %c0_93 = arith.constant 0 : index
    %228 = vector.load %arg26[%c0_92, %c0_93] : memref<1x128xf32, #tpu.memory_space<vmem>>, vector<1x128xf32>
    %229 = vector.broadcast %228 : vector<1x128xf32> to vector<8x128xf32>
    %230 = arith.addf %227, %229 : vector<8x128xf32>
    %c0_94 = arith.constant 0 : index
    %c0_95 = arith.constant 0 : index
    %231 = vector.load %arg21[%c0_94, %c0_95] : memref<4x16xbf16, #tpu.memory_space<vmem>>, vector<4x16xbf16>
    %c0_96 = arith.constant 0 : index
    %c0_97 = arith.constant 0 : index
    %232 = vector.load %arg25[%c0_96, %c0_97] : memref<16x128xbf16, #tpu.memory_space<vmem>>, vector<16x128xbf16>
    %cst_98 = arith.constant dense<0.000000e+00> : vector<4x128xf32>
    %233 = tpu.matmul %231, %232, %cst_98 {dimension_numbers = #tpu.dot_dimension_numbers<[1], [0], [0], [1], [0, 0, 1, 1], [], []>} : vector<4x16xbf16>, vector<16x128xbf16>, vector<4x128xf32> -> vector<4x128xf32>
    %c0_99 = arith.constant 0 : index
    %c0_100 = arith.constant 0 : index
    %234 = vector.load %arg22[%c0_99, %c0_100] : memref<32x128xbf16, #tpu.memory_space<vmem>>, vector<32x128xbf16>
    %c0_101 = arith.constant 0 : index
    %c0_102 = arith.constant 0 : index
    %235 = vector.load %arg27[%c0_101, %c0_102] : memref<128x32xbf16, #tpu.memory_space<vmem>>, vector<128x32xbf16>
    %c0_103 = arith.constant 0 : index
    %c0_104 = arith.constant 0 : index
    %236 = vector.load %arg28[%c0_103, %c0_104] : memref<1x32xf32, #tpu.memory_space<vmem>>, vector<1x32xf32>
    %c0_105 = arith.constant 0 : index
    %c0_106 = arith.constant 0 : index
    %237 = vector.load %arg20[%c0_105, %c0_106] : memref<8x32xf32, #tpu.memory_space<vmem>>, vector<8x32xf32>
    %238 = arith.truncf %237 : vector<8x32xf32> to vector<8x32xbf16>
    %cst_107 = arith.constant dense<0.000000e+00> : vector<8x128xf32>
    %239 = tpu.matmul %238, %234, %cst_107 {dimension_numbers = #tpu.dot_dimension_numbers<[1], [0], [0], [1], [0, 0, 1, 1], [], []>} : vector<8x32xbf16>, vector<32x128xbf16>, vector<8x128xf32> -> vector<8x128xf32>
    %240 = arith.addf %239, %230 : vector<8x128xf32>
    %241 = vector.extract_strided_slice %233 {offsets = [3, 0], sizes = [1, 128], strides = [1, 1]} : vector<4x128xf32> to vector<1x128xf32>
    %242 = vector.broadcast %241 : vector<1x128xf32> to vector<8x128xf32>
    %243 = arith.addf %240, %242 : vector<8x128xf32>
    %244 = arith.mulf %243, %243 : vector<8x128xf32>
    %245 = arith.mulf %243, %244 : vector<8x128xf32>
    %cst_108 = arith.constant 4.471500e-02 : f32
    %246 = vector.broadcast %cst_108 : f32 to vector<8x128xf32>
    %247 = arith.mulf %246, %245 : vector<8x128xf32>
    %248 = arith.addf %243, %247 : vector<8x128xf32>
    %cst_109 = arith.constant 0.797884583 : f32
    %249 = vector.broadcast %cst_109 : f32 to vector<8x128xf32>
    %250 = arith.mulf %249, %248 : vector<8x128xf32>
    %251 = math.tanh %250 : vector<8x128xf32>
    %cst_110 = arith.constant 1.000000e+00 : f32
    %252 = vector.broadcast %cst_110 : f32 to vector<8x128xf32>
    %253 = arith.addf %252, %251 : vector<8x128xf32>
    %cst_111 = arith.constant 5.000000e-01 : f32
    %254 = vector.broadcast %cst_111 : f32 to vector<8x128xf32>
    %255 = arith.mulf %254, %253 : vector<8x128xf32>
    %256 = arith.mulf %243, %255 : vector<8x128xf32>
    %257 = arith.truncf %256 : vector<8x128xf32> to vector<8x128xbf16>
    %cst_112 = arith.constant dense<0.000000e+00> : vector<8x32xf32>
    %258 = tpu.matmul %257, %235, %cst_112 {dimension_numbers = #tpu.dot_dimension_numbers<[1], [0], [0], [1], [0, 0, 1, 1], [], []>} : vector<8x128xbf16>, vector<128x32xbf16>, vector<8x32xf32> -> vector<8x32xf32>
    %259 = vector.broadcast %236 : vector<1x32xf32> to vector<8x32xf32>
    %260 = arith.addf %258, %259 : vector<8x32xf32>
    %cst_113 = arith.constant 7.845910e-02 : f32
    %261 = vector.broadcast %cst_113 : f32 to vector<8x32xf32>
    %262 = arith.mulf %261, %260 : vector<8x32xf32>
    %263 = arith.subf %237, %262 : vector<8x32xf32>
    %cst_114 = arith.constant 1.00309217 : f32
    %264 = vector.broadcast %cst_114 : f32 to vector<8x32xf32>
    %265 = arith.mulf %263, %264 : vector<8x32xf32>
    %cst_115 = arith.constant 0.522498548 : f32
    %266 = vector.broadcast %cst_115 : f32 to vector<8x32xf32>
    %267 = arith.mulf %266, %260 : vector<8x32xf32>
    %cst_116 = arith.constant 0.852640152 : f32
    %268 = vector.broadcast %cst_116 : f32 to vector<8x32xf32>
    %269 = arith.mulf %268, %265 : vector<8x32xf32>
    %270 = arith.addf %267, %269 : vector<8x32xf32>
    %271 = arith.truncf %270 : vector<8x32xf32> to vector<8x32xbf16>
    %cst_117 = arith.constant dense<0.000000e+00> : vector<8x128xf32>
    %272 = tpu.matmul %271, %234, %cst_117 {dimension_numbers = #tpu.dot_dimension_numbers<[1], [0], [0], [1], [0, 0, 1, 1], [], []>} : vector<8x32xbf16>, vector<32x128xbf16>, vector<8x128xf32> -> vector<8x128xf32>
    %273 = arith.addf %272, %230 : vector<8x128xf32>
    %274 = vector.extract_strided_slice %233 {offsets = [2, 0], sizes = [1, 128], strides = [1, 1]} : vector<4x128xf32> to vector<1x128xf32>
    %275 = vector.broadcast %274 : vector<1x128xf32> to vector<8x128xf32>
    %276 = arith.addf %273, %275 : vector<8x128xf32>
    %277 = arith.mulf %276, %276 : vector<8x128xf32>
    %278 = arith.mulf %276, %277 : vector<8x128xf32>
    %cst_118 = arith.constant 4.471500e-02 : f32
    %279 = vector.broadcast %cst_118 : f32 to vector<8x128xf32>
    %280 = arith.mulf %279, %278 : vector<8x128xf32>
    %281 = arith.addf %276, %280 : vector<8x128xf32>
    %cst_119 = arith.constant 0.797884583 : f32
    %282 = vector.broadcast %cst_119 : f32 to vector<8x128xf32>
    %283 = arith.mulf %282, %281 : vector<8x128xf32>
    %284 = math.tanh %283 : vector<8x128xf32>
    %cst_120 = arith.constant 1.000000e+00 : f32
    %285 = vector.broadcast %cst_120 : f32 to vector<8x128xf32>
    %286 = arith.addf %285, %284 : vector<8x128xf32>
    %cst_121 = arith.constant 5.000000e-01 : f32
    %287 = vector.broadcast %cst_121 : f32 to vector<8x128xf32>
    %288 = arith.mulf %287, %286 : vector<8x128xf32>
    %289 = arith.mulf %276, %288 : vector<8x128xf32>
    %290 = arith.truncf %289 : vector<8x128xf32> to vector<8x128xbf16>
    %cst_122 = arith.constant dense<0.000000e+00> : vector<8x32xf32>
    %291 = tpu.matmul %290, %235, %cst_122 {dimension_numbers = #tpu.dot_dimension_numbers<[1], [0], [0], [1], [0, 0, 1, 1], [], []>} : vector<8x128xbf16>, vector<128x32xbf16>, vector<8x32xf32> -> vector<8x32xf32>
    %292 = vector.broadcast %236 : vector<1x32xf32> to vector<8x32xf32>
    %293 = arith.addf %291, %292 : vector<8x32xf32>
    %cst_123 = arith.constant 0.522498548 : f32
    %294 = vector.broadcast %cst_123 : f32 to vector<8x32xf32>
    %295 = arith.mulf %294, %293 : vector<8x32xf32>
    %296 = arith.subf %270, %295 : vector<8x32xf32>
    %cst_124 = arith.constant 1.17282772 : f32
    %297 = vector.broadcast %cst_124 : f32 to vector<8x32xf32>
    %298 = arith.mulf %296, %297 : vector<8x32xf32>
    %cst_125 = arith.constant 0.852640152 : f32
    %299 = vector.broadcast %cst_125 : f32 to vector<8x32xf32>
    %300 = arith.mulf %299, %293 : vector<8x32xf32>
    %cst_126 = arith.constant 0.522498548 : f32
    %301 = vector.broadcast %cst_126 : f32 to vector<8x32xf32>
    %302 = arith.mulf %301, %298 : vector<8x32xf32>
    %303 = arith.addf %300, %302 : vector<8x32xf32>
    %304 = arith.truncf %303 : vector<8x32xf32> to vector<8x32xbf16>
    %cst_127 = arith.constant dense<0.000000e+00> : vector<8x128xf32>
    %305 = tpu.matmul %304, %234, %cst_127 {dimension_numbers = #tpu.dot_dimension_numbers<[1], [0], [0], [1], [0, 0, 1, 1], [], []>} : vector<8x32xbf16>, vector<32x128xbf16>, vector<8x128xf32> -> vector<8x128xf32>
    %306 = arith.addf %305, %230 : vector<8x128xf32>
    %307 = vector.extract_strided_slice %233 {offsets = [1, 0], sizes = [1, 128], strides = [1, 1]} : vector<4x128xf32> to vector<1x128xf32>
    %308 = vector.broadcast %307 : vector<1x128xf32> to vector<8x128xf32>
    %309 = arith.addf %306, %308 : vector<8x128xf32>
    %310 = arith.mulf %309, %309 : vector<8x128xf32>
    %311 = arith.mulf %309, %310 : vector<8x128xf32>
    %cst_128 = arith.constant 4.471500e-02 : f32
    %312 = vector.broadcast %cst_128 : f32 to vector<8x128xf32>
    %313 = arith.mulf %312, %311 : vector<8x128xf32>
    %314 = arith.addf %309, %313 : vector<8x128xf32>
    %cst_129 = arith.constant 0.797884583 : f32
    %315 = vector.broadcast %cst_129 : f32 to vector<8x128xf32>
    %316 = arith.mulf %315, %314 : vector<8x128xf32>
    %317 = math.tanh %316 : vector<8x128xf32>
    %cst_130 = arith.constant 1.000000e+00 : f32
    %318 = vector.broadcast %cst_130 : f32 to vector<8x128xf32>
    %319 = arith.addf %318, %317 : vector<8x128xf32>
    %cst_131 = arith.constant 5.000000e-01 : f32
    %320 = vector.broadcast %cst_131 : f32 to vector<8x128xf32>
    %321 = arith.mulf %320, %319 : vector<8x128xf32>
    %322 = arith.mulf %309, %321 : vector<8x128xf32>
    %323 = arith.truncf %322 : vector<8x128xf32> to vector<8x128xbf16>
    %cst_132 = arith.constant dense<0.000000e+00> : vector<8x32xf32>
    %324 = tpu.matmul %323, %235, %cst_132 {dimension_numbers = #tpu.dot_dimension_numbers<[1], [0], [0], [1], [0, 0, 1, 1], [], []>} : vector<8x128xbf16>, vector<128x32xbf16>, vector<8x32xf32> -> vector<8x32xf32>
    %325 = vector.broadcast %236 : vector<1x32xf32> to vector<8x32xf32>
    %326 = arith.addf %324, %325 : vector<8x32xf32>
    %cst_133 = arith.constant 0.852640152 : f32
    %327 = vector.broadcast %cst_133 : f32 to vector<8x32xf32>
    %328 = arith.mulf %327, %326 : vector<8x32xf32>
    %329 = arith.subf %303, %328 : vector<8x32xf32>
    %cst_134 = arith.constant 1.91388083 : f32
    %330 = vector.broadcast %cst_134 : f32 to vector<8x32xf32>
    %331 = arith.mulf %329, %330 : vector<8x32xf32>
    %cst_135 = arith.constant 0.996917307 : f32
    %332 = vector.broadcast %cst_135 : f32 to vector<8x32xf32>
    %333 = arith.mulf %332, %326 : vector<8x32xf32>
    %cst_136 = arith.constant 7.845910e-02 : f32
    %334 = vector.broadcast %cst_136 : f32 to vector<8x32xf32>
    %335 = arith.mulf %334, %331 : vector<8x32xf32>
    %336 = arith.addf %333, %335 : vector<8x32xf32>
    %337 = arith.truncf %336 : vector<8x32xf32> to vector<8x32xbf16>
    %cst_137 = arith.constant dense<0.000000e+00> : vector<8x128xf32>
    %338 = tpu.matmul %337, %234, %cst_137 {dimension_numbers = #tpu.dot_dimension_numbers<[1], [0], [0], [1], [0, 0, 1, 1], [], []>} : vector<8x32xbf16>, vector<32x128xbf16>, vector<8x128xf32> -> vector<8x128xf32>
    %339 = arith.addf %338, %230 : vector<8x128xf32>
    %340 = vector.extract_strided_slice %233 {offsets = [0, 0], sizes = [1, 128], strides = [1, 1]} : vector<4x128xf32> to vector<1x128xf32>
    %341 = vector.broadcast %340 : vector<1x128xf32> to vector<8x128xf32>
    %342 = arith.addf %339, %341 : vector<8x128xf32>
    %343 = arith.mulf %342, %342 : vector<8x128xf32>
    %344 = arith.mulf %342, %343 : vector<8x128xf32>
    %cst_138 = arith.constant 4.471500e-02 : f32
    %345 = vector.broadcast %cst_138 : f32 to vector<8x128xf32>
    %346 = arith.mulf %345, %344 : vector<8x128xf32>
    %347 = arith.addf %342, %346 : vector<8x128xf32>
    %cst_139 = arith.constant 0.797884583 : f32
    %348 = vector.broadcast %cst_139 : f32 to vector<8x128xf32>
    %349 = arith.mulf %348, %347 : vector<8x128xf32>
    %350 = math.tanh %349 : vector<8x128xf32>
    %cst_140 = arith.constant 1.000000e+00 : f32
    %351 = vector.broadcast %cst_140 : f32 to vector<8x128xf32>
    %352 = arith.addf %351, %350 : vector<8x128xf32>
    %cst_141 = arith.constant 5.000000e-01 : f32
    %353 = vector.broadcast %cst_141 : f32 to vector<8x128xf32>
    %354 = arith.mulf %353, %352 : vector<8x128xf32>
    %355 = arith.mulf %342, %354 : vector<8x128xf32>
    %356 = arith.truncf %355 : vector<8x128xf32> to vector<8x128xbf16>
    %cst_142 = arith.constant dense<0.000000e+00> : vector<8x32xf32>
    %357 = tpu.matmul %356, %235, %cst_142 {dimension_numbers = #tpu.dot_dimension_numbers<[1], [0], [0], [1], [0, 0, 1, 1], [], []>} : vector<8x128xbf16>, vector<128x32xbf16>, vector<8x32xf32> -> vector<8x32xf32>
    %358 = vector.broadcast %236 : vector<1x32xf32> to vector<8x32xf32>
    %359 = arith.addf %357, %358 : vector<8x32xf32>
    %cst_143 = arith.constant 0.996917307 : f32
    %360 = vector.broadcast %cst_143 : f32 to vector<8x32xf32>
    %361 = arith.mulf %360, %359 : vector<8x32xf32>
    %362 = arith.subf %336, %361 : vector<8x32xf32>
    %cst_144 = arith.constant 12.7454948 : f32
    %363 = vector.broadcast %cst_144 : f32 to vector<8x32xf32>
    %364 = arith.mulf %362, %363 : vector<8x32xf32>
    %cst_145 = arith.constant 1.000000e+00 : f32
    %365 = vector.broadcast %cst_145 : f32 to vector<8x32xf32>
    %366 = arith.mulf %365, %359 : vector<8x32xf32>
    %cst_146 = arith.constant 0.000000e+00 : f32
    %367 = vector.broadcast %cst_146 : f32 to vector<8x32xf32>
    %368 = arith.mulf %367, %364 : vector<8x32xf32>
    %369 = arith.addf %366, %368 : vector<8x32xf32>
    %370 = arith.mulf %369, %369 : vector<8x32xf32>
    %cst_147 = arith.constant dense<0.000000e+00> : vector<8xf32>
    %371 = vector.multi_reduction <add>, %370, %cst_147 [1] : vector<8x32xf32> to vector<8xf32>
    %372 = vector.shape_cast %371 : vector<8xf32> to vector<8x1xf32>
    %373 = math.sqrt %372 : vector<8x1xf32>
    %cst_148 = arith.constant 9.99999993E-9 : f32
    %374 = vector.broadcast %cst_148 : f32 to vector<8x1xf32>
    %375 = arith.addf %373, %374 : vector<8x1xf32>
    %376 = vector.broadcast %375 : vector<8x1xf32> to vector<8x32xf32>
    %377 = arith.divf %369, %376 : vector<8x32xf32>
    %c0_149 = arith.constant 0 : index
    %c0_150 = arith.constant 0 : index
    %378 = vector.load %arg29[%c0_149, %c0_150] : memref<8x32xf32, #tpu.memory_space<vmem>>, vector<8x32xf32>
    tpu.vector_store %arg29[%c0_149, %c0_150], %377 {strides = array<i32>} : memref<8x32xf32, #tpu.memory_space<vmem>>, vector<8x32xf32>,
    return
  }
}

</mosaic_0001>

<bundles_post_ra>
// kernel: tpu_custom_call.1
= control target key start
LH: loop header
LB: loop body
LE: loop exit
PB: predicated region body
PF: predicated region fallthrough
CT: control target
= control target key end

     0   :  { %s2861_s6 = smov 1   ;;  %s2862_s10 = smov 2   ;;  %s3445_s0 = inlined_call_operand.smem [shape: u32[30], index: -1, kind: input, shape index: {}] }
   0x1   :  { %s2921_s5 = sld [smem:[%s3445_s0]]   ;;  %s2863_s14 = smov 3  }
   0x2   :  { %s2926_s9 = sld [smem:[%s3445_s0 + %s2861_s6]]   ;;  %s2864_s18 = smov 4  }
   0x3   :  { %s2931_s13 = sld [smem:[%s3445_s0 + %s2862_s10]]   ;;  %s2865_s22 = smov 5  }
   0x4   :  { %s2936_s17 = sld [smem:[%s3445_s0 + %s2863_s14]]   ;;  %s2866_s26 = smov 6  }
   0x5   :  { %s2941_s21 = sld [smem:[%s3445_s0 + %s2864_s18]]   ;;  %s2867_s30 = smov 7  }
   0x6   :  { %s2946_s25 = sld [smem:[%s3445_s0 + %s2865_s22]]   ;;  %s2868_s4 = smov 8  }
   0x7   :  { %s2951_s29 = sld [smem:[%s3445_s0 + %s2866_s26]]   ;;  %s2869_s10 = smov 9  }
   0x8   :  { %s2956_s3 = sld [smem:[%s3445_s0 + %s2867_s30]]   ;;  %s2870_s15 = smov 10  }
   0x9   :  { %s2961_s8 = sld [smem:[%s3445_s0 + %s2868_s4]]   ;;  %s2871_s20 = smov 11  }
   0xa   :  { %s2966_s14 = sld [smem:[%s3445_s0 + %s2869_s10]]   ;;  %s2872_s26 = smov 12  }
   0xb   :  { %s2971_s19 = sld [smem:[%s3445_s0 + %s2870_s15]]   ;;  %s2873_s1 = smov 13  }
   0xc   :  { %s2976_s24 = sld [smem:[%s3445_s0 + %s2871_s20]]   ;;  %s2874_s7 = smov 14  }
   0xd   :  { %s2981_s30 = sld [smem:[%s3445_s0 + %s2872_s26]]   ;;  %s2875_s15 = smov 15  }
   0xe   :  { %s2986_s6 = sld [smem:[%s3445_s0 + %s2873_s1]]   ;;  %s2876_s22 = smov 16  }
   0xf   :  { %s2991_s12 = sld [smem:[%s3445_s0 + %s2874_s7]]   ;;  %s2877_s28 = smov 17  }
  0x10   :  { %s2996_s20 = sld [smem:[%s3445_s0 + %s2875_s15]]   ;;  %s2878_s7 = smov 18  }
  0x11   :  { %s3001_s27 = sld [smem:[%s3445_s0 + %s2876_s22]]   ;;  %s2879_s15 = smov 19  }
  0x12   :  { %s3006_s4 = sld [smem:[%s3445_s0 + %s2877_s28]]   ;;  %s2880_s22 = smov 20  }
  0x13   :  { %s2881_s28 = smov 21  }
  0x14   :  { %3450 = sst [smem:[#allocation19_spill]] %s2986_s6 }
  0x15   :  { %s3011_s6 = sld [smem:[%s3445_s0 + %s2878_s7]]   ;;  %s2882_s7 = smov 22  }
  0x16   :  { %3451 = sst [smem:[#allocation20_spill]] %s2996_s20 }
  0x17   :  { %3452 = sst [smem:[#allocation21_spill]] %s3001_s27 }
  0x18   :  { %3453 = sst [smem:[#allocation22_spill]] %s3006_s4 }
  0x19   :  { %s3016_s20 = sld [smem:[%s3445_s0 + %s2879_s15]]   ;;  %s2883_s15 = smov 23  }
  0x1a   :  { %s3021_s27 = sld [smem:[%s3445_s0 + %s2880_s22]]   ;;  %s2884_s22 = smov 24  }
  0x1b   :  { %3454 = sst [smem:[#allocation23_spill]] %s3011_s6 }
  0x1c   :  { %s3026_s4 = sld [smem:[%s3445_s0 + %s2881_s28]]   ;;  %s2885_s28 = smov 25  }
  0x1d   :  { %s3031_s6 = sld [smem:[%s3445_s0 + %s2882_s7]]   ;;  %s2886_s7 = smov 26  }
  0x1f   :  { %3455 = sst [smem:[#allocation24_spill]] %s3016_s20 }
  0x20   :  { %3456 = sst [smem:[#allocation25_spill]] %s3021_s27 }
  0x21   :  { %s3036_s20 = sld [smem:[%s3445_s0 + %s2883_s15]]   ;;  %s2887_s15 = smov 27  }
  0x22   :  { %3457 = sst [smem:[#allocation26_spill]] %s3026_s4 }
  0x23   :  { %3458 = sst [smem:[#allocation27_spill]] %s3031_s6 }
  0x24   :  { %s3041_s27 = sld [smem:[%s3445_s0 + %s2884_s22]]   ;;  %s2888_s22 = smov 28  }
  0x25   :  { %s3046_s4 = sld [smem:[%s3445_s0 + %s2885_s28]]   ;;  %s2889_s28 = smov 29  }
  0x26   :  { %s3051_s6 = sld [smem:[%s3445_s0 + %s2886_s7]]  }
  0x27   :  { %3459 = sst [smem:[#allocation28_spill]] %s3036_s20 }
  0x28   :  { %s3056_s20 = sld [smem:[%s3445_s0 + %s2887_s15]]  }
  0x2a   :  { %3460 = sst [smem:[#allocation29_spill]] %s3041_s27 }
  0x2b   :  { %3461 = sst [smem:[#allocation30_spill]] %s3046_s4 }
  0x2c   :  { %s3061_s27 = sld [smem:[%s3445_s0 + %s2888_s22]]  }
  0x2d   :  { %s3066_s4 = sld [smem:[%s3445_s0 + %s2889_s28]]  }
  0x2e   :  { %64 = vsyncpa [#allocation3], 0 }
  0x2f   :  { %65 = vsyncpa [#allocation6], 0 }
  0x30   :  { %66 = vsyncpa [#allocation9], 0 }
  0x31   :  { %67 = vsyncpa [#allocation12], 0 }
  0x32   :  { %68 = vsyncpa [#allocation4], 0  ;;  %s2890_s7 = smov [#allocation5]   ;;  %s2891_s11 = smov [#allocation8]  }
  0x33   :  { %s89_s10 = sshll.u32 %s2890_s7, 4  ;;  %s109_s15 = sshll.u32 %s2891_s11, 4  ;;  %s90_s10 = int_to_ptr.vmem [resolvable:$true] %s89_s10  ;;  %s110_s15 = int_to_ptr.vmem [resolvable:$true] %s109_s15 }
  0x34   :  { %s2697_s16 = scalar_lea.hbm %s2936_s17, 64 }
  0x35   :  { %p2698_p0 = scmp.ne.s32.totalorder %s2936_s17, %s2697_s16  ;;  %p2701_p1 = scmp.lt.u32.totalorder %s2697_s16, %s2936_s17 }
  0x37   :  { %p2703_p2 = pnand %p2701_p1, %p2698_p0 }
  0x39   :  { %2706 = shalt.err (!%p2703_p2)
}
  0x3a   :  { %s2707_s0 = scalar_lea.vmem %s90_s10, 64  ;;  %p2712_p4 = scmp.lt.s32.totalorder %s90_s10, %s90_s10 }
  0x3b   :  { %p2708_p3 = scmp.ne.s32.totalorder %s90_s10, %s2707_s0  ;;  %p2713_p5 = scmp.lt.s32.totalorder %s2707_s0, %s2707_s0 }
  0x3d   :  { %p2714_p6 = por %p2713_p5, %p2712_p4 }
  0x3f   :  { %p2715_p7 = pnand %p2714_p6, %p2708_p3 }
  0x41   :  { %2718 = shalt.err (!%p2715_p7)
}
  0x42   :  { %92 = dma.hbm_to_vmem [thread:$0]  %s2936_s17, 64, %s90_s10, [#allocation6]  }
  0x43   :  { %s2719_s18 = scalar_lea.hbm %s2946_s25, 16 }
  0x44   :  { %p2720_p8 = scmp.ne.s32.totalorder %s2946_s25, %s2719_s18  ;;  %p2723_p9 = scmp.lt.u32.totalorder %s2719_s18, %s2946_s25 }
  0x46   :  { %p2725_p10 = pnand %p2723_p9, %p2720_p8 }
  0x48   :  { %2728 = shalt.err (!%p2725_p10)
}
  0x49   :  { %s2729_s22 = scalar_lea.vmem %s110_s15, 16  ;;  %s2733_s23 = scalar_lea.vmem %s110_s15, 32 }
  0x4a   :  { %p2730_p11 = scmp.ne.s32.totalorder %s110_s15, %s2729_s22  ;;  %p2734_p12 = scmp.lt.s32.totalorder %s110_s15, %s110_s15 }
  0x4b   :  { %p2735_p13 = scmp.lt.s32.totalorder %s2733_s23, %s2729_s22 }
  0x4d   :  { %p2736_p0 = por %p2735_p13, %p2734_p12 }
  0x4f   :  { %p2737_p1 = pnand %p2736_p0, %p2730_p11 }
  0x51   :  { %2740 = shalt.err (!%p2737_p1)
}
  0x52   :  { %112 = dma.hbm_to_vmem [thread:$0]  %s2946_s25, 16, %s110_s15, [#allocation9]  }
  0x53   :  { %s2892_s26 = smov [#allocation2]   ;;  %s2893_s28 = smov [#allocation7]  }
  0x54   :  { %s79_s17 = sshll.u32 %s2892_s26, 4  ;;  %s99_s1 = sshll.u32 %s2893_s28, 4  ;;  %s80_s17 = int_to_ptr.vmem [resolvable:$true] %s79_s17  ;;  %s100_s1 = int_to_ptr.vmem [resolvable:$true] %s99_s1 }
  0x55   :  { %s2741_s2 = scalar_lea.hbm %s2931_s13, 64 }
  0x56   :  { %p2742_p2 = scmp.ne.s32.totalorder %s2931_s13, %s2741_s2  ;;  %p2745_p3 = scmp.lt.u32.totalorder %s2741_s2, %s2931_s13 }
  0x58   :  { %p2747_p4 = pnand %p2745_p3, %p2742_p2 }
  0x5a   :  { %2750 = shalt.err (!%p2747_p4)
}
  0x5b   :  { %s2751_s7 = scalar_lea.vmem %s80_s17, 64  ;;  %p2756_p6 = scmp.lt.s32.totalorder %s80_s17, %s80_s17 }
  0x5c   :  { %p2752_p5 = scmp.ne.s32.totalorder %s80_s17, %s2751_s7  ;;  %p2757_p7 = scmp.lt.s32.totalorder %s2751_s7, %s2751_s7 }
  0x5e   :  { %p2758_p8 = por %p2757_p7, %p2756_p6 }
  0x60   :  { %p2759_p9 = pnand %p2758_p8, %p2752_p5 }
  0x62   :  { %2762 = shalt.err (!%p2759_p9)
}
  0x63   :  { %82 = dma.hbm_to_vmem [thread:$0]  %s2931_s13, 64, %s80_s17, [#allocation3]  }
  0x64   :  { %s2763_s25 = scalar_lea.hbm %s2941_s21, 16 }
  0x65   :  { %p2764_p10 = scmp.ne.s32.totalorder %s2941_s21, %s2763_s25  ;;  %p2767_p11 = scmp.lt.u32.totalorder %s2763_s25, %s2941_s21 }
  0x67   :  { %p2769_p12 = pnand %p2767_p11, %p2764_p10 }
  0x69   :  { %2772 = shalt.err (!%p2769_p12)
}
  0x6a   :  { %s2773_s10 = scalar_lea.vmem %s100_s1, 16  ;;  %s2777_s11 = scalar_lea.vmem %s100_s1, 32 }
  0x6b   :  { %p2774_p13 = scmp.ne.s32.totalorder %s100_s1, %s2773_s10  ;;  %p2778_p0 = scmp.lt.s32.totalorder %s100_s1, %s100_s1 }
  0x6c   :  { %p2779_p1 = scmp.lt.s32.totalorder %s2777_s11, %s2773_s10 }
  0x6e   :  { %p2780_p2 = por %p2779_p1, %p2778_p0 }
  0x70   :  { %p2781_p3 = pnand %p2780_p2, %p2774_p13 }
  0x72   :  { %2784 = shalt.err (!%p2781_p3)
}
  0x73   :  { %102 = dma.hbm_to_vmem [thread:$0]  %s2941_s21, 16, %s100_s1, [#allocation6]  }
  0x74   :  { %s2894_s15 = smov [#allocation10]   ;;  %s2895_s16 = smov [#allocation11]  }
  0x75   :  { %s121_s13 = sshll.u32 %s2894_s15, 4  ;;  %s133_s0 = sshll.u32 %s2895_s16, 4  ;;  %s122_s13 = int_to_ptr.vmem [resolvable:$true] %s121_s13  ;;  %s134_s0 = int_to_ptr.vmem [resolvable:$true] %s133_s0 }
  0x76   :  { %s2785_s18 = scalar_lea.hbm %s2956_s3, 16 }
  0x77   :  { %p2786_p4 = scmp.ne.s32.totalorder %s2956_s3, %s2785_s18  ;;  %p2789_p5 = scmp.lt.u32.totalorder %s2785_s18, %s2956_s3 }
  0x79   :  { %p2791_p6 = pnand %p2789_p5, %p2786_p4 }
  0x7b   :  { %2794 = shalt.err (!%p2791_p6)
}
  0x7c   :  { %s2795_s22 = scalar_lea.vmem %s122_s13, 16  ;;  %s2799_s23 = scalar_lea.vmem %s122_s13, 32 }
  0x7d   :  { %p2796_p7 = scmp.ne.s32.totalorder %s122_s13, %s2795_s22  ;;  %p2800_p8 = scmp.lt.s32.totalorder %s122_s13, %s122_s13 }
  0x7e   :  { %p2801_p9 = scmp.lt.s32.totalorder %s2799_s23, %s2795_s22 }
  0x80   :  { %p2802_p10 = por %p2801_p9, %p2800_p8 }
  0x82   :  { %p2803_p11 = pnand %p2802_p10, %p2796_p7 }
  0x84   :  { %2806 = shalt.err (!%p2803_p11)
}
  0x85   :  { %124 = dma.hbm_to_vmem [thread:$0]  %s2956_s3, 16, %s122_s13, [#allocation9]  }
  0x86   :  { %s2807_s21 = scalar_lea.hbm %s2966_s14, 16 }
  0x87   :  { %p2808_p12 = scmp.ne.s32.totalorder %s2966_s14, %s2807_s21  ;;  %p2811_p13 = scmp.lt.u32.totalorder %s2807_s21, %s2966_s14 }
  0x89   :  { %p2813_p0 = pnand %p2811_p13, %p2808_p12 }
  0x8b   :  { %2816 = shalt.err (!%p2813_p0)
}
  0x8c   :  { %s2817_s26 = scalar_lea.vmem %s134_s0, 16  ;;  %s2821_s17 = scalar_lea.vmem %s134_s0, 32 }
  0x8d   :  { %p2818_p1 = scmp.ne.s32.totalorder %s134_s0, %s2817_s26  ;;  %p2822_p2 = scmp.lt.s32.totalorder %s134_s0, %s134_s0 }
  0x8e   :  { %p2823_p3 = scmp.lt.s32.totalorder %s2821_s17, %s2817_s26 }
  0x90   :  { %p2824_p4 = por %p2823_p3, %p2822_p2 }
  0x92   :  { %p2825_p5 = pnand %p2824_p4, %p2818_p1 }
  0x94   :  { %2828 = shalt.err (!%p2825_p5)
}
  0x95   :  { %136 = dma.hbm_to_vmem [thread:$0]  %s2966_s14, 16, %s134_s0, [#allocation12]  }
  0x96   :  { %2851 = dma.done.wait [#allocation3], 64  }
  0x97   :  { %2852 = vsyncadd [#allocation3], 4294967232 }
  0x98   :  { %2853 = dma.done.wait [#allocation6], 80  }
  0x99   :  { %2854 = vsyncadd [#allocation6], 4294967216 }
  0x9a   :  { %2855 = dma.done.wait [#allocation9], 32  }
  0x9b   :  { %2856 = vsyncadd [#allocation9], 4294967264 }
  0x9c   :  { %2857 = dma.done.wait [#allocation12], 16  }
  0x9d   :  { %2858 = vsyncadd [#allocation12], 4294967280  ;;  %vm200_vm0 = vcmask 261120   ;;  %v3093_v0 = vld [vmem:[%s2921_s5] sm:$0xff]  ;;  %v3096_v1 = vld [vmem:[%s2921_s5 + $0x8] sm:$0xff]  ;;  %v2896_v15 = vmov 0.0  }
  0x9e   :  { %v201_v2 = vsel %vm200_vm0, %v3093_v0, 0.0  ;;  %v204_v3 = vsel %vm200_vm0, %v3096_v1, 0.0  ;;  %v2602_v14 = vld [vmem:[%s2951_s29] sm:$0xff]   ;;  %2289 = vmatprep.subr.bf16.mxu0 %v2896_v15  ;;  %2297 = vmatprep.subr.bf16.mxu1 %v2896_v15  ;;  %v2603_v16 = vld [vmem:[%s2951_s29 + $0x8] sm:$0xff]   ;;  %vm2897_vm1 = vmmov 0   ;;  %s2898_s5 = smov 88  }
  0x9f   :  { %202 = vadd.xlane.f32.xlu0 %v201_v2  ;;  %2290 = vmatpush3.bf16.msra.mxu0 %v2602_v14  ;;  %v2127_v25 = vld [vmem:[#allocation7] ss:$0 sm:$0xff]  ;;  %v2128_v29 = vld [vmem:[#allocation8] ss:$0 sm:$0xff]  ;;  %v2129_v34 = vld [vmem:[#allocation10] ss:$0 sm:$0xff] }
  0xa0   :  { %2293 = vmatprep.mubr.msk.bf16.mxu0 %vm2897_vm1, %v2896_v15  ;;  %2291 = vmatprep.subr.bf16.mxu0 %v2896_v15  ;;  %s2899_s29 = smov 96   ;;  %s2900_s3 = smov 120   ;;  %vm316_vm2 = vcmask 64512   ;;  %v196_v54 = vld [vmem:[%s2926_s9] sm:$0xff]  ;;  %vm368_vm3 = vcmask 130048   ;;  %v197_v58 = vld [vmem:[%s2926_s9 + $0x8] sm:$0xff] }
  0xa1   :  { %2299 = vmatprep.mubr.msk.bf16.mxu1 %vm2897_vm1, %v2896_v15  ;;  %s2901_s14 = smov 112   ;;  %s2902_s28 = smov 80   ;;  %vm842_vm4 = vcmask 195584  }
  0xa2   :  { %s2903_s1 = smov 104   ;;  %s2904_s2 = smov 72  }
  0xa3   :  { %205 = vadd.xlane.f32.xlu0 %v204_v3  ;;  %2292 = vmatpush3.bf16.msra.mxu0 %v2603_v16  ;;  %s2905_s9 = smov 64   ;;  %s2906_s7 = smov 48  }
  0xa4   :  { %2303 = vmatprep.subr.bf16.mxu0 %v2896_v15  ;;  %s2907_s25 = smov 40   ;;  %s2908_s10 = smov 56  }
  0xa5   :  { %s2909_s11 = smov 8   ;;  %s2910_s15 = smov 16  }
  0xa6   :  { %s2911_s13 = smov 24   ;;  %s3467_s16 = sld [smem:[#allocation24_spill]] }
  0xa7   :  { %s3468_s0 = sld [smem:[#allocation29_spill]]  ;;  %s3469_s18 = sld [smem:[#allocation28_spill]] }
  0xa8   :  { %s3470_s22 = sld [smem:[#allocation30_spill]]  ;;  %s3471_s23 = sld [smem:[#allocation26_spill]] }
  0xa9   :  { %s3472_s21 = sld [smem:[#allocation27_spill]]  ;;  %s3473_s26 = sld [smem:[#allocation25_spill]] }
 0x12c   :  { %v203_v4 = vpop.xlane.xlu0 %202 }
 0x12d   :  { %v208_v5 = vmul.f32 0.03125, %v203_v4 }
 0x12f   :  { %v210_v6 = vsub.f32 %v3093_v0, %v208_v5 }
 0x130   :  { %v206_v7 = vpop.xlane.xlu0 %205 }
 0x131   :  { %v209_v8 = vmul.f32 0.03125, %v206_v7  ;;  %v212_v9 = vmul.f32 %v210_v6, %v210_v6 }
 0x133   :  { %v211_v10 = vsub.f32 %v3096_v1, %v209_v8  ;;  %v214_v11 = vsel %vm200_vm0, %v212_v9, 0.0 }
 0x134   :  { %215 = vadd.xlane.f32.xlu1 %v214_v11 }
 0x135   :  { %v213_v12 = vmul.f32 %v211_v10, %v211_v10 }
 0x137   :  { %v217_v13 = vsel %vm200_vm0, %v213_v12, 0.0 }
 0x138   :  { %218 = vadd.xlane.f32.xlu1 %v217_v13 }
 0x1c1   :  { %v216_v17 = vpop.xlane.xlu1 %215 }
 0x1c2   :  { %v220_v18 = vmul.f32 0.03125, %v216_v17 }
 0x1c4   :  { %v222_v19 = vadd.f32 1e-05, %v220_v18 }
 0x1c5   :  { %v219_v20 = vpop.xlane.xlu1 %218 }
 0x1c6   :  { %2633 = vrsqrt.f32 %v222_v19  ;;  %v221_v21 = vmul.f32 0.03125, %v219_v20 }
 0x1c8   :  { %v223_v22 = vadd.f32 1e-05, %v221_v21 }
 0x1ca   :  { %2635 = vrsqrt.f32 %v223_v22 }
 0x1d0   :  { %v2634_v23 = vpop.eup %2633 }
 0x1d1   :  { %v226_v24 = vmul.f32 %v2634_v23, %v210_v6 }
 0x1d3   :  { %v234_v28 = vmul.f32 %v2127_v25, %v226_v24 }
 0x1d4   :  { %v2636_v26 = vpop.eup %2635 }
 0x1d5   :  { %v227_v27 = vmul.f32 %v2636_v26, %v211_v10  ;;  %v242_v31 = vadd.f32 %v2128_v29, %v234_v28 }
 0x1d7   :  { %v235_v30 = vmul.f32 %v2127_v25, %v227_v27 }
 0x1d9   :  { %v243_v32 = vadd.f32 %v2128_v29, %v235_v30 }
 0x1db   :  { %v244_v33 = vpack.c.bf16 %v243_v32, %v242_v31 }
 0x1dd   :  { %2294 = vmatmul.mubr.msk.bf16.vlgmr.msra.gmra.mrb[0].mxu0 %vm200_vm0, %v244_v33 }
 0x1de   :  { %2305 = vmatprep.mubr.msk.bf16.mxu0 %vm2897_vm1, %v2896_v15 }
 0x2b0   :  { %v305_v35 = vpop.f32.mrb[0].mxu0 }
 0x2b1   :  { %v2295_v36 = vpop.f32.mrb[1].mxu0  ;;  %v306_v38 = vadd.f32 %v2129_v34, %v305_v35 }
 0x2b2   :  { %v308_v37 = vpop.f32.mrb[2].mxu0 }
 0x2b3   :  { %v309_v39 = vadd.f32 %v2129_v34, %v308_v37  ;;  %v2296_v40 = vpop.f32.mrb[3].mxu0 }
 0x2b5   :  { %v3119_v41 = vpack.c.bf16 %v309_v39, %v306_v38 }
 0x2b7   :  { %441 = vrot.lane.b32.xlu1 %v3119_v41, %s2898_s5  ;;  %314 = vrot.lane.b32.xlu0 %v3119_v41, %s2899_s29 }
 0x2bb   :  { %439 = vrot.lane.b32.xlu1 %v3119_v41, %s2900_s3  ;;  %564 = vrot.lane.b32.xlu0 %v3119_v41, %s2901_s14 }
 0x2bf   :  { %566 = vrot.lane.b32.xlu1 %v3119_v41, %s2902_s28  ;;  %689 = vrot.lane.b32.xlu0 %v3119_v41, %s2903_s1 }
 0x2c3   :  { %691 = vrot.lane.b32.xlu1 %v3119_v41, %s2904_s2 }
 0x329   :  { %v315_v42 = vpop.permute.xlu0 %314  ;;  %v442_v44 = vpop.permute.xlu1 %441 }
 0x32a   :  { %v321_v43 = vsel %vm316_vm2, %v315_v42, 0  ;;  %v447_v46 = vsel %vm316_vm2, %v442_v44, 0 }
 0x32b   :  { %2298 = vmatpush3.bf16.xpose.msra.mxu1 %v321_v43 }
 0x32c   :  { %2309 = vmatprep.subr.bf16.mxu1 %v2896_v15 }
 0x32d   :  { %v440_v45 = vpop.permute.xlu1 %439  ;;  %v565_v50 = vpop.permute.xlu0 %564 }
 0x331   :  { %v567_v47 = vpop.permute.xlu1 %566  ;;  %v690_v52 = vpop.permute.xlu0 %689 }
 0x332   :  { %2300 = vmatmul.mubr.msk.bf16.vlgmr.msra.gmra.mrb[0].mxu1 %vm316_vm2, %v3119_v41  ;;  %v572_v48 = vsel %vm316_vm2, %v567_v47, 0 }
 0x333   :  { %2310 = vmatpush3.bf16.xpose.msra.mxu1 %v447_v46  ;;  %2311 = vmatprep.mubr.msk.bf16.mxu1 %vm2897_vm1, %v2896_v15 }
 0x334   :  { %2321 = vmatprep.subr.bf16.mxu1 %v2896_v15 }
 0x335   :  { %v692_v49 = vpop.permute.xlu1 %691 }
 0x336   :  { %v697_v51 = vsel %vm316_vm2, %v692_v49, 0 }
 0x33a   :  { %2312 = vmatmul.mubr.msk.bf16.vlgmr.msra.gmra.mrb[4].mxu1 %vm316_vm2, %v440_v45 }
 0x33b   :  { %2322 = vmatpush3.bf16.xpose.msra.mxu1 %v572_v48  ;;  %2323 = vmatprep.mubr.msk.bf16.mxu1 %vm2897_vm1, %v2896_v15 }
 0x33c   :  { %2333 = vmatprep.subr.bf16.mxu1 %v2896_v15 }
 0x342   :  { %2324 = vmatmul.mubr.msk.bf16.vlgmr.msra.gmra.mrb[8].mxu1 %vm316_vm2, %v565_v50 }
 0x343   :  { %2334 = vmatpush3.bf16.xpose.msra.mxu1 %v697_v51  ;;  %2335 = vmatprep.mubr.msk.bf16.mxu1 %vm2897_vm1, %v2896_v15 }
 0x344   :  { %2345 = vmatprep.subr.bf16.mxu1 %v2896_v15 }
 0x34a   :  { %2336 = vmatmul.mubr.msk.bf16.vlgmr.msra.gmra.mrb[12].mxu1 %vm316_vm2, %v690_v52 }
 0x34b   :  { %2349 = vmatprep.mubr.msk.bf16.mxu1 %vm2897_vm1, %v2896_v15 }
 0x405   :  { %v357_v53 = vpop.f32.mrb[0].mxu1 }
 0x406   :  { %v364_v55 = vmul.f32 0.35355338, %v357_v53  ;;  %v2301_v56 = vpop.f32.mrb[1].mxu1 }
 0x407   :  { %v360_v57 = vpop.f32.mrb[2].mxu1 }
 0x408   :  { %v365_v59 = vmul.f32 0.35355338, %v360_v57  ;;  %v2302_v60 = vpop.f32.mrb[3].mxu1  ;;  %v366_v61 = vadd.f32 %v364_v55, %v196_v54 }
 0x40a   :  { %v369_v62 = vsel %vm368_vm3, %v366_v61, -inf  ;;  %v367_v63 = vadd.f32 %v365_v59, %v197_v58 }
 0x40b   :  { %370 = vmax.xlane.f32.xlu1 %v369_v62 }
 0x40c   :  { %v372_v2 = vsel %vm368_vm3, %v367_v63, -inf }
 0x40d   :  { %373 = vmax.xlane.f32.xlu0 %v372_v2  ;;  %v483_v3 = vpop.f32.mrb[4].mxu1 }
 0x40e   :  { %v490_v4 = vmul.f32 0.35355338, %v483_v3  ;;  %v2313_v5 = vpop.f32.mrb[5].mxu1 }
 0x40f   :  { %v486_v6 = vpop.f32.mrb[6].mxu1 }
 0x410   :  { %v491_v7 = vmul.f32 0.35355338, %v486_v6  ;;  %v2314_v8 = vpop.f32.mrb[7].mxu1  ;;  %v492_v9 = vadd.f32 %v490_v4, %v196_v54 }
 0x412   :  { %v494_v10 = vsel %vm368_vm3, %v492_v9, -inf  ;;  %v493_v11 = vadd.f32 %v491_v7, %v197_v58 }
 0x413   :  { %495 = vmax.xlane.f32.xlu0 %v494_v10 }
 0x414   :  { %v497_v16 = vsel %vm368_vm3, %v493_v11, -inf }
 0x415   :  { %v608_v12 = vpop.f32.mrb[8].mxu1 }
 0x416   :  { %v615_v13 = vmul.f32 0.35355338, %v608_v12  ;;  %v2325_v14 = vpop.f32.mrb[9].mxu1 }
 0x417   :  { %498 = vmax.xlane.f32.xlu0 %v497_v16  ;;  %v611_v17 = vpop.f32.mrb[10].mxu1 }
 0x418   :  { %v616_v18 = vmul.f32 0.35355338, %v611_v17  ;;  %v2326_v19 = vpop.f32.mrb[11].mxu1  ;;  %v617_v20 = vadd.f32 %v615_v13, %v196_v54 }
 0x41a   :  { %v619_v21 = vsel %vm368_vm3, %v617_v20, -inf  ;;  %v618_v22 = vadd.f32 %v616_v18, %v197_v58 }
 0x41b   :  { %620 = vmax.xlane.f32.xlu1 %v619_v21 }
 0x41c   :  { %v622_v23 = vsel %vm368_vm3, %v618_v22, -inf }
 0x41d   :  { %623 = vmax.xlane.f32.xlu0 %v622_v23  ;;  %v733_v24 = vpop.f32.mrb[12].mxu1 }
 0x41e   :  { %v740_v25 = vmul.f32 0.35355338, %v733_v24  ;;  %v2337_v26 = vpop.f32.mrb[13].mxu1 }
 0x41f   :  { %v736_v27 = vpop.f32.mrb[14].mxu1 }
 0x420   :  { %v741_v28 = vmul.f32 0.35355338, %v736_v27  ;;  %v2338_v29 = vpop.f32.mrb[15].mxu1  ;;  %v742_v30 = vadd.f32 %v740_v25, %v196_v54 }
 0x422   :  { %v744_v31 = vsel %vm368_vm3, %v742_v30, -inf  ;;  %v743_v32 = vadd.f32 %v741_v28, %v197_v58 }
 0x423   :  { %745 = vmax.xlane.f32.xlu1 %v744_v31 }
 0x424   :  { %v747_v33 = vsel %vm368_vm3, %v743_v32, -inf }
 0x425   :  { %748 = vmax.xlane.f32.xlu0 %v747_v33 }
 0x434   :  { %392 = vrot.lane.b32.xlu1 %v3119_v41, %s2905_s9 }
 0x498   :  { %v371_v34 = vpop.xlane.xlu1 %370 }
 0x499   :  { %v375_v35 = vsub.f32 %v366_v61, %v371_v34 }
 0x49a   :  { %v374_v36 = vpop.xlane.xlu0 %373 }
 0x49b   :  { %v377_v37 = vmul.f32 1.442695, %v375_v35  ;;  %v376_v38 = vsub.f32 %v367_v63, %v374_v36 }
 0x49d   :  { %2637 = vpow2.f32 %v377_v37  ;;  %v379_v39 = vmul.f32 1.442695, %v376_v38 }
 0x49f   :  { %2639 = vpow2.f32 %v379_v39 }
 0x4a0   :  { %v496_v40 = vpop.xlane.xlu0 %495 }
 0x4a1   :  { %v500_v42 = vsub.f32 %v492_v9, %v496_v40 }
 0x4a3   :  { %v502_v43 = vmul.f32 1.442695, %v500_v42 }
 0x4a4   :  { %v499_v44 = vpop.xlane.xlu0 %498 }
 0x4a5   :  { %2641 = vpow2.f32 %v502_v43  ;;  %v501_v45 = vsub.f32 %v493_v11, %v499_v44 }
 0x4a7   :  { %v2638_v46 = vpop.eup %2637  ;;  %v504_v47 = vmul.f32 1.442695, %v501_v45 }
 0x4a8   :  { %v621_v48 = vpop.xlane.xlu1 %620  ;;  %v381_v49 = vsel %vm368_vm3, %v2638_v46, 0.0 }
 0x4a9   :  { %v2640_v50 = vpop.eup %2639  ;;  %2643 = vpow2.f32 %v504_v47  ;;  %v625_v51 = vsub.f32 %v617_v20, %v621_v48  ;;  %382 = vadd.xlane.f32.xlu1 %v381_v49 }
 0x4aa   :  { %v624_v52 = vpop.xlane.xlu0 %623  ;;  %v384_v53 = vsel %vm368_vm3, %v2640_v50, 0.0 }
 0x4ab   :  { %v627_v54 = vmul.f32 1.442695, %v625_v51  ;;  %v626_v55 = vsub.f32 %v618_v22, %v624_v52  ;;  %385 = vadd.xlane.f32.xlu0 %v384_v53  ;;  %v2604_v53 = vld [vmem:[%s2961_s8] sm:$0xff]  }
 0x4ac   :  { %2346 = vmatpush3.bf16.msra.mxu1 %v2604_v53 }
 0x4ad   :  { %2645 = vpow2.f32 %v627_v54  ;;  %v629_v56 = vmul.f32 1.442695, %v626_v55  ;;  %2347 = vmatprep.subr.bf16.mxu1 %v2896_v15 }
 0x4af   :  { %v2642_v57 = vpop.eup %2641  ;;  %2647 = vpow2.f32 %v629_v56 }
 0x4b0   :  { %v746_v58 = vpop.xlane.xlu1 %745  ;;  %v506_v59 = vsel %vm368_vm3, %v2642_v57, 0.0 }
 0x4b1   :  { %v750_v60 = vsub.f32 %v742_v30, %v746_v58  ;;  %507 = vadd.xlane.f32.xlu1 %v506_v59  ;;  %v2605_v58 = vld [vmem:[%s2961_s8 + $0x8] sm:$0xff]   ;;  %s3462_s8 = sld [smem:[#allocation19_spill]] }
 0x4b2   :  { %v749_v61 = vpop.xlane.xlu0 %748  ;;  %2348 = vmatpush3.bf16.msra.mxu1 %v2605_v58 }
 0x4b3   :  { %v2644_v62 = vpop.eup %2643  ;;  %v752_v63 = vmul.f32 1.442695, %v750_v60  ;;  %v751_v2 = vsub.f32 %v743_v32, %v749_v61  ;;  %2361 = vmatprep.subr.bf16.mxu1 %v2896_v15 }
 0x4b4   :  { %v393_v3 = vpop.permute.xlu1 %392  ;;  %v509_v4 = vsel %vm368_vm3, %v2644_v62, 0.0 }
 0x4b5   :  { %2649 = vpow2.f32 %v752_v63  ;;  %v754_v5 = vmul.f32 1.442695, %v751_v2  ;;  %2304 = vmatpush3.bf16.msra.mxu0 %v393_v3  ;;  %510 = vadd.xlane.f32.xlu0 %v509_v4 }
 0x4b6   :  { %2315 = vmatprep.subr.bf16.mxu0 %v2896_v15 }
 0x4b7   :  { %v2646_v6 = vpop.eup %2645  ;;  %2651 = vpow2.f32 %v754_v5 }
 0x4b8   :  { %v631_v7 = vsel %vm368_vm3, %v2646_v6, 0.0 }
 0x4b9   :  { %v2648_v8 = vpop.eup %2647  ;;  %632 = vadd.xlane.f32.xlu1 %v631_v7 }
 0x4ba   :  { %v634_v9 = vsel %vm368_vm3, %v2648_v8, 0.0 }
 0x4bb   :  { %635 = vadd.xlane.f32.xlu0 %v634_v9 }
 0x4bf   :  { %v2650_v10 = vpop.eup %2649 }
 0x4c0   :  { %v756_v11 = vsel %vm368_vm3, %v2650_v10, 0.0 }
 0x4c1   :  { %v2652_v12 = vpop.eup %2651  ;;  %757 = vadd.xlane.f32.xlu1 %v756_v11 }
 0x4c2   :  { %v759_v13 = vsel %vm368_vm3, %v2652_v12, 0.0 }
 0x4c3   :  { %760 = vadd.xlane.f32.xlu0 %v759_v13 }
 0x4d2   :  { %642 = vrot.lane.b32.xlu1 %v3119_v41, %s2906_s7 }
 0x4d6   :  { %767 = vrot.lane.b32.xlu1 %v3119_v41, %s2907_s25 }
 0x4d9   :  { %517 = vrot.lane.b32.xlu0 %v3119_v41, %s2908_s10 }
 0x536   :  { %v383_v14 = vpop.xlane.xlu1 %382 }
 0x537   :  { %2653 = vrcp.f32 %v383_v14 }
 0x538   :  { %v386_v16 = vpop.xlane.xlu0 %385 }
 0x539   :  { %2655 = vrcp.f32 %v386_v16 }
 0x53e   :  { %v508_v22 = vpop.xlane.xlu1 %507 }
 0x541   :  { %v2654_v17 = vpop.eup %2653 }
 0x542   :  { %v511_v18 = vpop.xlane.xlu0 %510  ;;  %v389_v20 = vmul.f32 %v2654_v17, %v2638_v46 }
 0x543   :  { %v2656_v19 = vpop.eup %2655  ;;  %2657 = vrcp.f32 %v511_v18 }
 0x544   :  { %v390_v21 = vmul.f32 %v2656_v19, %v2640_v50  ;;  %2659 = vrcp.f32 %v508_v22 }
 0x546   :  { %v391_v23 = vpack.c.bf16 %v390_v21, %v389_v20  ;;  %v633_v41 = vpop.xlane.xlu1 %632 }
 0x548   :  { %2306 = vmatmul.mubr.msk.bf16.vlgmr.msra.gmra.mrb[4].mxu0 %vm368_vm3, %v391_v23  ;;  %v636_v24 = vpop.xlane.xlu0 %635  ;;  %v2144_v23 = vld [vmem:[#allocation11] ss:$0 sm:$0xff] }
 0x549   :  { %2317 = vmatprep.mubr.msk.bf16.mxu0 %vm2897_vm1, %v2896_v15  ;;  %2661 = vrcp.f32 %v636_v24 }
 0x54a   :  { %2663 = vrcp.f32 %v633_v41 }
 0x54d   :  { %v2658_v25 = vpop.eup %2657 }
 0x54e   :  { %v2660_v27 = vpop.eup %2659  ;;  %v515_v28 = vmul.f32 %v2658_v25, %v2644_v62  ;;  %v758_v29 = vpop.xlane.xlu1 %757 }
 0x54f   :  { %v514_v30 = vmul.f32 %v2660_v27, %v2642_v57 }
 0x550   :  { %v761_v26 = vpop.xlane.xlu0 %760 }
 0x551   :  { %2665 = vrcp.f32 %v761_v26  ;;  %v516_v32 = vpack.c.bf16 %v515_v28, %v514_v30 }
 0x552   :  { %2667 = vrcp.f32 %v758_v29  ;;  %v643_v34 = vpop.permute.xlu1 %642 }
 0x553   :  { %v2662_v33 = vpop.eup %2661 }
 0x554   :  { %v518_v31 = vpop.permute.xlu0 %517  ;;  %v2664_v35 = vpop.eup %2663  ;;  %v640_v36 = vmul.f32 %v2662_v33, %v2648_v8 }
 0x555   :  { %2316 = vmatpush3.bf16.msra.mxu0 %v518_v31  ;;  %v639_v37 = vmul.f32 %v2664_v35, %v2646_v6 }
 0x556   :  { %2327 = vmatprep.subr.bf16.mxu0 %v2896_v15  ;;  %v768_v40 = vpop.permute.xlu1 %767 }
 0x557   :  { %v641_v38 = vpack.c.bf16 %v640_v36, %v639_v37 }
 0x558   :  { %2318 = vmatmul.mubr.msk.bf16.vlgmr.msra.gmra.mrb[8].mxu0 %vm368_vm3, %v516_v32 }
 0x559   :  { %2328 = vmatpush3.bf16.msra.mxu0 %v643_v34  ;;  %2329 = vmatprep.mubr.msk.bf16.mxu0 %vm2897_vm1, %v2896_v15 }
 0x55a   :  { %2339 = vmatprep.subr.bf16.mxu0 %v2896_v15 }
 0x55b   :  { %v2666_v39 = vpop.eup %2665 }
 0x55c   :  { %v2668_v42 = vpop.eup %2667  ;;  %v765_v43 = vmul.f32 %v2666_v39, %v2652_v12 }
 0x55d   :  { %v764_v44 = vmul.f32 %v2668_v42, %v2650_v10  ;;  %v2607_v42 = vld [vmem:[%s2981_s30 + $0x8] sm:$0xff]  }
 0x55f   :  { %v766_v45 = vpack.c.bf16 %v765_v43, %v764_v44 }
 0x560   :  { %2330 = vmatmul.mubr.msk.bf16.vlgmr.msra.gmra.mrb[12].mxu0 %vm368_vm3, %v641_v38 }
 0x561   :  { %2340 = vmatpush3.bf16.msra.mxu0 %v768_v40  ;;  %2341 = vmatprep.mubr.msk.bf16.mxu0 %vm2897_vm1, %v2896_v15  ;;  %v2606_v40 = vld [vmem:[%s2981_s30] sm:$0xff]   ;;  %s3465_s30 = sld [smem:[#allocation22_spill]] }
 0x562   :  { %2353 = vmatprep.subr.bf16.mxu0 %v2896_v15 }
 0x568   :  { %2342 = vmatmul.mubr.msk.bf16.vlgmr.msra.gmra.mrb[16].mxu0 %vm368_vm3, %v766_v45 }
 0x569   :  { %2357 = vmatprep.mubr.msk.bf16.mxu0 %vm2897_vm1, %v2896_v15  ;;  %2354 = vmatpush3.bf16.msra.mxu0 %v2606_v40 }
 0x56a   :  { %2355 = vmatprep.subr.bf16.mxu0 %v2896_v15 }
 0x56d   :  { %2356 = vmatpush3.bf16.msra.mxu0 %v2607_v42 }
 0x56e   :  { %2381 = vmatprep.subr.bf16.mxu0 %v2896_v15 }
 0x61b   :  { %v432_v46 = vpop.f32.mrb[4].mxu0 }
 0x61c   :  { %v2307_v47 = vpop.f32.mrb[5].mxu0 }
 0x61d   :  { %v435_v48 = vpop.f32.mrb[6].mxu0 }
 0x61e   :  { %v2308_v49 = vpop.f32.mrb[7].mxu0 }
 0x62b   :  { %v557_v50 = vpop.f32.mrb[8].mxu0 }
 0x62c   :  { %v2319_v51 = vpop.f32.mrb[9].mxu0 }
 0x62d   :  { %v560_v52 = vpop.f32.mrb[10].mxu0  ;;  %v2145_v51 = vld [vmem:[%s2971_s19] ss:$0 sm:$0xff]  ;;  %s3463_s19 = sld [smem:[#allocation20_spill]] }
 0x62e   :  { %v2587_v54 = vpack.i.bf16 %v560_v52, %v557_v50  ;;  %v2320_v55 = vpop.f32.mrb[11].mxu0 }
 0x62f   :  { %v2146_v55 = vld [vmem:[%s2976_s24] ss:$0 sm:$0xff]  ;;  %s3464_s24 = sld [smem:[#allocation21_spill]] }
 0x630   :  { %2588 = vrot.lane.b32.xlu1 %v2587_v54, %s2909_s11 }
 0x633   :  { %v682_v56 = vpop.f32.mrb[12].mxu0 }
 0x634   :  { %v2331_v57 = vpop.f32.mrb[13].mxu0 }
 0x635   :  { %v685_v59 = vpop.f32.mrb[14].mxu0 }
 0x636   :  { %v2592_v60 = vpack.i.bf16 %v685_v59, %v682_v56  ;;  %v2332_v61 = vpop.f32.mrb[15].mxu0 }
 0x637   :  { %v2609_v61 = vld [vmem:[%s2991_s12 + $0x8] sm:$0xff]  }
 0x638   :  { %2593 = vrot.lane.b32.xlu0 %v2592_v60, %s2910_s15  ;;  %v2608_v60 = vld [vmem:[%s2991_s12] sm:$0xff]  }
 0x63b   :  { %v807_v62 = vpop.f32.mrb[16].mxu0 }
 0x63c   :  { %v2343_v63 = vpop.f32.mrb[17].mxu0 }
 0x63d   :  { %v810_v2 = vpop.f32.mrb[18].mxu0  ;;  %v2611_v63 = vld [vmem:[%s2991_s12 + $0x18] sm:$0xff]  }
 0x63e   :  { %v2597_v3 = vpack.i.bf16 %v810_v2, %v807_v62  ;;  %v2344_v4 = vpop.f32.mrb[19].mxu0  ;;  %v2610_v62 = vld [vmem:[%s2991_s12 + $0x10] sm:$0xff]   ;;  %v2612_v2 = vld [vmem:[%s2991_s12 + $0x20] sm:$0xff]  }
 0x63f   :  { %v2614_v4 = vld [vmem:[%s2991_s12 + $0x30] sm:$0xff]  }
 0x640   :  { %2598 = vrot.lane.b32.xlu1 %v2597_v3, %s2911_s13  ;;  %v2613_v3 = vld [vmem:[%s2991_s12 + $0x28] sm:$0xff]  }
 0x6a2   :  { %v2589_v5 = vpop.permute.xlu1 %2588 }
 0x6a3   :  { %v2591_v7 = vunpack.i.h.bf16 %v2589_v5  ;;  %v2590_v8 = vunpack.i.l.bf16 %v2589_v5  ;;  %v2615_v5 = vld [vmem:[%s2991_s12 + $0x38] sm:$0xff]   ;;  %s3466_s12 = sld [smem:[#allocation23_spill]] }
 0x6a5   :  { %v839_v12 = vsel %vm316_vm2, %v435_v48, %v2591_v7  ;;  %v838_v13 = vsel %vm316_vm2, %v432_v46, %v2590_v8 }
 0x6aa   :  { %v2594_v6 = vpop.permute.xlu0 %2593 }
 0x6ab   :  { %v2596_v9 = vunpack.i.h.bf16 %v2594_v6  ;;  %v2595_v10 = vunpack.i.l.bf16 %v2594_v6  ;;  %v2147_v6 = vld [vmem:[%s3462_s8] ss:$0 sm:$0xff] }
 0x6ad   :  { %v841_v17 = vsel %vm368_vm3, %v839_v12, %v2596_v9  ;;  %v840_v18 = vsel %vm368_vm3, %v838_v13, %v2595_v10 }
 0x6b2   :  { %v2599_v11 = vpop.permute.xlu1 %2598 }
 0x6b3   :  { %v2601_v14 = vunpack.i.h.bf16 %v2599_v11  ;;  %v2600_v16 = vunpack.i.l.bf16 %v2599_v11 }
 0x6b5   :  { %v844_v19 = vsel %vm842_vm4, %v841_v17, %v2601_v14  ;;  %v843_v20 = vsel %vm842_vm4, %v840_v18, %v2600_v16 }
 0x6b6   :  { %v849_v21 = vpack.c.bf16 %v844_v19, %v843_v20 }
 0x6b8   :  { %2350 = vmatmul.mubr.msk.bf16.vlgmr.msra.gmra.mrb[16].mxu1 %vm200_vm0, %v849_v21 }
 0x6b9   :  { %2377 = vmatprep.mubr.msk.bf16.mxu1 %vm2897_vm1, %v2896_v15  ;;  %2362 = vmatpush3.bf16.msra.mxu1 %v2608_v60 }
 0x6ba   :  { %2363 = vmatprep.subr.bf16.mxu1 %v2896_v15 }
 0x6bd   :  { %2364 = vmatpush3.bf16.msra.mxu1 %v2609_v61 }
 0x6be   :  { %2365 = vmatprep.subr.bf16.mxu1 %v2896_v15 }
 0x6c1   :  { %2366 = vmatpush3.bf16.msra.mxu1 %v2610_v62 }
 0x6c2   :  { %2367 = vmatprep.subr.bf16.mxu1 %v2896_v15 }
 0x6c5   :  { %2368 = vmatpush3.bf16.msra.mxu1 %v2611_v63 }
 0x6c6   :  { %2369 = vmatprep.subr.bf16.mxu1 %v2896_v15 }
 0x6c9   :  { %2370 = vmatpush3.bf16.msra.mxu1 %v2612_v2  ;;  %v2161_v2 = vld [vmem:[%s3465_s30] ss:$0 sm:$0xff] }
 0x6ca   :  { %2371 = vmatprep.subr.bf16.mxu1 %v2896_v15 }
 0x6cd   :  { %2372 = vmatpush3.bf16.msra.mxu1 %v2613_v3 }
 0x6ce   :  { %2373 = vmatprep.subr.bf16.mxu1 %v2896_v15 }
 0x6d1   :  { %2374 = vmatpush3.bf16.msra.mxu1 %v2614_v4 }
 0x6d2   :  { %2375 = vmatprep.subr.bf16.mxu1 %v2896_v15 }
 0x6d5   :  { %2376 = vmatpush3.bf16.msra.mxu1 %v2615_v5 }
 0x6d6   :  { %2409 = vmatprep.subr.bf16.mxu1 %v2896_v15 }
 0x78b   :  { %v899_v22 = vpop.f32.mrb[16].mxu1 }
 0x78c   :  { %v906_v24 = vadd.f32 %v899_v22, %v3093_v0  ;;  %v2351_v41 = vpop.f32.mrb[17].mxu1 }
 0x78d   :  { %v902_v25 = vpop.f32.mrb[18].mxu1 }
 0x78e   :  { %v3199_v26 = vadd.f32 %v2144_v23, %v906_v24  ;;  %v907_v27 = vadd.f32 %v902_v25, %v3096_v1  ;;  %v2352_v28 = vpop.f32.mrb[19].mxu1 }
 0x790   :  { %v3202_v29 = vadd.f32 %v2144_v23, %v907_v27  ;;  %v919_v30 = vsel %vm200_vm0, %v3199_v26, 0.0 }
 0x791   :  { %920 = vadd.xlane.f32.xlu0 %v919_v30 }
 0x792   :  { %v922_v31 = vsel %vm200_vm0, %v3202_v29, 0.0 }
 0x793   :  { %923 = vadd.xlane.f32.xlu1 %v922_v31 }
 0x81e   :  { %v921_v0 = vpop.xlane.xlu0 %920 }
 0x81f   :  { %v925_v32 = vmul.f32 0.03125, %v921_v0 }
 0x820   :  { %v924_v33 = vpop.xlane.xlu1 %923 }
 0x821   :  { %v927_v34 = vsub.f32 %v3199_v26, %v925_v32  ;;  %v926_v35 = vmul.f32 0.03125, %v924_v33 }
 0x823   :  { %v928_v1 = vsub.f32 %v3202_v29, %v926_v35  ;;  %v929_v36 = vmul.f32 %v927_v34, %v927_v34 }
 0x825   :  { %v931_v37 = vsel %vm200_vm0, %v929_v36, 0.0  ;;  %v930_v38 = vmul.f32 %v928_v1, %v928_v1 }
 0x826   :  { %932 = vadd.xlane.f32.xlu0 %v931_v37 }
 0x827   :  { %v934_v39 = vsel %vm200_vm0, %v930_v38, 0.0 }
 0x82a   :  { %935 = vadd.xlane.f32.xlu0 %v934_v39 }
 0x8b3   :  { %v933_v43 = vpop.xlane.xlu0 %932 }
 0x8b4   :  { %v937_v44 = vmul.f32 0.03125, %v933_v43 }
 0x8b6   :  { %v939_v45 = vadd.f32 1e-05, %v937_v44 }
 0x8b7   :  { %v936_v46 = vpop.xlane.xlu0 %935 }
 0x8b8   :  { %2669 = vrsqrt.f32 %v939_v45  ;;  %v938_v47 = vmul.f32 0.03125, %v936_v46 }
 0x8ba   :  { %v940_v48 = vadd.f32 1e-05, %v938_v47 }
 0x8bc   :  { %2671 = vrsqrt.f32 %v940_v48 }
 0x8c2   :  { %v2670_v49 = vpop.eup %2669 }
 0x8c3   :  { %v943_v50 = vmul.f32 %v2670_v49, %v927_v34  ;;  %v2159_v34 = vld [vmem:[%s3463_s19] ss:$0 sm:$0xff] }
 0x8c5   :  { %v951_v53 = vmul.f32 %v2145_v51, %v943_v50 }
 0x8c6   :  { %v2672_v52 = vpop.eup %2671 }
 0x8c7   :  { %v944_v54 = vmul.f32 %v2672_v52, %v928_v1  ;;  %v959_v57 = vadd.f32 %v2146_v55, %v951_v53 }
 0x8c9   :  { %v952_v56 = vmul.f32 %v2145_v51, %v944_v54 }
 0x8cb   :  { %v960_v58 = vadd.f32 %v2146_v55, %v952_v56 }
 0x8cd   :  { %v961_v59 = vpack.c.bf16 %v960_v58, %v959_v57 }
 0x8cf   :  { %2358 = vmatmul.mubr.msk.bf16.vlgmr.msra.gmra.mrb[20].mxu0 %vm200_vm0, %v961_v59  ;;  %v2160_v59 = vld [vmem:[%s3464_s24] ss:$0 sm:$0xff] }
 0x8d0   :  { %2383 = vmatprep.mubr.msk.bf16.mxu0 %vm2897_vm1, %v2896_v15 }
 0x9a2   :  { %v1022_v7 = vpop.f32.mrb[20].mxu0 }
 0x9a3   :  { %v1023_v8 = vadd.f32 %v2147_v6, %v1022_v7  ;;  %v2359_v9 = vpop.f32.mrb[21].mxu0  ;;  %v1209_v7 = vld [vmem:[#allocation2] sm:$0xf] }
 0x9a4   :  { %v1025_v10 = vpop.f32.mrb[22].mxu0  ;;  %v2617_v9 = vld [vmem:[%s3466_s12 + $0x8] sm:$0xff]  }
 0x9a5   :  { %v1029_v11 = vmul.f32 %v1023_v8, %v1023_v8  ;;  %v1026_v12 = vadd.f32 %v2147_v6, %v1025_v10  ;;  %v2360_v13 = vpop.f32.mrb[23].mxu0 }
 0x9a7   :  { %v1031_v14 = vmul.f32 %v1029_v11, %v1023_v8  ;;  %v1030_v16 = vmul.f32 %v1026_v12, %v1026_v12 }
 0x9a9   :  { %v1033_v17 = vmul.f32 0.044715, %v1031_v14  ;;  %v1032_v18 = vmul.f32 %v1030_v16, %v1026_v12  ;;  %v1334_v16 = vld [vmem:[#allocation5] sm:$0xf] }
 0x9ab   :  { %v1035_v19 = vadd.f32 %v1033_v17, %v1023_v8  ;;  %v1034_v20 = vmul.f32 0.044715, %v1032_v18  ;;  %v2163_v17 = vld [vmem:[%s3467_s16] ss:$0 sm:$0xff] }
 0x9ad   :  { %v1037_v21 = vmul.f32 0.7978846, %v1035_v19  ;;  %v1036_v22 = vadd.f32 %v1034_v20, %v1026_v12 }
 0x9af   :  { %2673 = vtanh.f32 %v1037_v21  ;;  %v1038_v23 = vmul.f32 0.7978846, %v1036_v22 }
 0x9b1   :  { %2675 = vtanh.f32 %v1038_v23 }
 0x9b9   :  { %v2674_v24 = vpop.eup %2673 }
 0x9ba   :  { %v1041_v41 = vadd.f32 1.0, %v2674_v24 }
 0x9bb   :  { %v2676_v25 = vpop.eup %2675 }
 0x9bc   :  { %v1043_v27 = vmul.f32 0.5, %v1041_v41  ;;  %v1042_v28 = vadd.f32 1.0, %v2676_v25  ;;  %v2618_v41 = vld [vmem:[%s3468_s0] sm:$0xff]  }
 0x9bd   :  { %v2619_v25 = vld [vmem:[%s3469_s18] sm:$0xff]  }
 0x9be   :  { %v1044_v30 = vmul.f32 0.5, %v1042_v28  ;;  %v1045_v31 = vmul.f32 %v1043_v27, %v1023_v8  ;;  %v2616_v8 = vld [vmem:[%s3466_s12] sm:$0xff]  }
 0x9c0   :  { %v1046_v0 = vmul.f32 %v1044_v30, %v1026_v12  ;;  %v2620_v30 = vld [vmem:[%s3468_s0 + $0x8] sm:$0xff]  }
 0x9c2   :  { %v1063_v32 = vpack.c.bf16 %v1046_v0, %v1045_v31  ;;  %v2621_v31 = vld [vmem:[%s3469_s18 + $0x8] sm:$0xff]  }
 0x9c4   :  { %2378 = vmatmul.mubr.bf16.vlgmr.msra.gmra.mrb[20].mxu1 %v1063_v32 }
 0x9c5   :  { %2413 = vmatprep.mubr.msk.bf16.mxu1 %vm2897_vm1, %v2896_v15  ;;  %2410 = vmatpush3.bf16.msra.mxu1 %v2619_v25 }
 0x9c6   :  { %2411 = vmatprep.subr.bf16.mxu1 %v2896_v15 }
 0x9c9   :  { %2412 = vmatpush3.bf16.msra.mxu1 %v2621_v31 }
 0x9ca   :  { %2423 = vmatprep.subr.bf16.mxu1 %v2896_v15 }
 0xa97   :  { %v1146_v33 = vpop.f32.mrb[20].mxu1 }
 0xa98   :  { %v1153_v35 = vadd.f32 %v1146_v33, %v3199_v26  ;;  %v2379_v1 = vpop.f32.mrb[21].mxu1 }
 0xa99   :  { %v1149_v36 = vpop.f32.mrb[22].mxu1 }
 0xa9a   :  { %v1154_v37 = vadd.f32 %v1149_v36, %v3202_v29  ;;  %v2380_v38 = vpop.f32.mrb[23].mxu1  ;;  %v1162_v39 = vadd.f32 %v2159_v34, %v1153_v35  ;;  %v1506_v35 = vld [vmem:[%s3471_s23] sm:$0x3] }
 0xa9c   :  { %v1166_v40 = vsel %vm200_vm0, %v1162_v39, 0.0  ;;  %v1163_v42 = vadd.f32 %v2159_v34, %v1154_v37  ;;  %v2623_v34 = vld [vmem:[%s3470_s22] sm:$0xff]  }
 0xa9d   :  { %1167 = vadd.xlane.f32.xlu0 %v1166_v40 }
 0xa9e   :  { %v1169_v43 = vsel %vm200_vm0, %v1163_v42, 0.0 }
 0xa9f   :  { %1170 = vadd.xlane.f32.xlu1 %v1169_v43 }
 0xb2a   :  { %v1168_v44 = vpop.xlane.xlu0 %1167 }
 0xb2b   :  { %v1172_v45 = vmul.f32 0.03125, %v1168_v44 }
 0xb2c   :  { %v1171_v46 = vpop.xlane.xlu1 %1170 }
 0xb2d   :  { %v1174_v47 = vsub.f32 %v1162_v39, %v1172_v45  ;;  %v1173_v48 = vmul.f32 0.03125, %v1171_v46  ;;  %v3284_v45 = vld [vmem:[%s3472_s21] sm:$0xff]  }
 0xb2f   :  { %v1175_v49 = vsub.f32 %v1163_v42, %v1173_v48  ;;  %v1176_v26 = vmul.f32 %v1174_v47, %v1174_v47  ;;  %v3294_v48 = vld [vmem:[%s3473_s26] sm:$0xff] }
 0xb31   :  { %v1178_v50 = vsel %vm200_vm0, %v1176_v26, 0.0  ;;  %v1177_v29 = vmul.f32 %v1175_v49, %v1175_v49 }
 0xb32   :  { %1179 = vadd.xlane.f32.xlu0 %v1178_v50 }
 0xb33   :  { %v1181_v51 = vsel %vm200_vm0, %v1177_v29, 0.0 }
 0xb34   :  { %1182 = vadd.xlane.f32.xlu1 %v1181_v51 }
 0xbbf   :  { %v1180_v52 = vpop.xlane.xlu0 %1179 }
 0xbc0   :  { %v1184_v53 = vmul.f32 0.03125, %v1180_v52  ;;  %v1636_v52 = vlaneseq }
 0xbc1   :  { %v1183_v54 = vpop.xlane.xlu1 %1182 }
 0xbc2   :  { %v1186_v55 = vadd.f32 1e-05, %v1184_v53  ;;  %v1185_v56 = vmul.f32 0.03125, %v1183_v54  ;;  %v1637_v54 = vshrl.u32 %v1636_v52, 7 }
 0xbc4   :  { %2677 = vrsqrt.f32 %v1186_v55  ;;  %v1187_v57 = vadd.f32 1e-05, %v1185_v56 }
 0xbc6   :  { %2679 = vrsqrt.f32 %v1187_v57  ;;  %v1797_v57 = vsub.s32 2, %v1637_v54 }
 0xbce   :  { %v2678_v58 = vpop.eup %2677 }
 0xbcf   :  { %v1190_v60 = vmul.f32 %v2678_v58, %v1174_v47  ;;  %v3289_v47 = vld [vmem:[%s3472_s21 + $0x8] sm:$0xff]   ;;  %v1902_v58 = vsub.s32 1, %v1637_v54 }
 0xbd0   :  { %v2680_v61 = vpop.eup %2679 }
 0xbd1   :  { %v1191_v62 = vmul.f32 %v2680_v61, %v1175_v49  ;;  %v1198_v63 = vmul.f32 %v2160_v59, %v1190_v60  ;;  %v1580_v49 = vpack.c.bf16 %v3294_v48, %v3294_v48  ;;  %v3309_v61 = vld [vmem:[%s3056_s20] sm:$0xff]  }
 0xbd3   :  { %v1199_v3 = vmul.f32 %v2160_v59, %v1191_v62  ;;  %v1206_v4 = vadd.f32 %v2161_v2, %v1198_v63  ;;  %v2007_v59 = vsub.s32 0, %v1637_v54 }
 0xbd5   :  { %v1207_v5 = vadd.f32 %v2161_v2, %v1199_v3  ;;  %v3320_v3 = vld [vmem:[%s3056_s20 + $0x8] sm:$0xff]  }
 0xbd7   :  { %v1208_v6 = vpack.c.bf16 %v1207_v5, %v1206_v4  ;;  %v3325_v4 = vld [vmem:[%s3056_s20 + $0x10] sm:$0xff]   ;;  %v3330_v5 = vld [vmem:[%s3056_s20 + $0x18] sm:$0xff]  }
 0xbd9   :  { %2382 = vmatpush3.bf16.msra.mxu0 %v1208_v6 }
 0xbda   :  { %2387 = vmatprep.subr.bf16.mxu0 %v2896_v15 }
 0xbdc   :  { %2384 = vmatmul.mubr.msk.bf16.vlgmr.msra.gmra.mrb[24].mxu0 %vm368_vm3, %v1209_v7  ;;  %v3339_v7 = vld [vmem:[%s3056_s20 + $0x28] sm:$0xff]  }
 0xbdd   :  { %2388 = vmatpush3.bf16.msra.mxu0 %v2616_v8  ;;  %2391 = vmatprep.mubr.msk.bf16.mxu0 %vm2897_vm1, %v2896_v15  ;;  %v3344_v8 = vld [vmem:[%s3056_s20 + $0x30] sm:$0xff]  }
 0xbde   :  { %2389 = vmatprep.subr.bf16.mxu0 %v2896_v15 }
 0xbe1   :  { %2390 = vmatpush3.bf16.msra.mxu0 %v2617_v9  ;;  %v3349_v9 = vld [vmem:[%s3056_s20 + $0x38] sm:$0xff]  }
 0xbe2   :  { %2395 = vmatprep.subr.bf16.mxu0 %v2896_v15 }
 0xcaf   :  { %v1247_v10 = vpop.f32.mrb[24].mxu0 }
 0xcb0   :  { %v1257_v11 = vpack.c.bf16 %v1247_v10, %v1247_v10  ;;  %v2385_v12 = vpop.f32.mrb[25].mxu0 }
 0xcb1   :  { %v1250_v13 = vpop.f32.mrb[26].mxu0 }
 0xcb2   :  { %2392 = vmatmul.mubr.msk.bf16.vlgmr.msra.gmra.mrb[28].mxu0 %vm200_vm0, %v1257_v11  ;;  %v2386_v14 = vpop.f32.mrb[27].mxu0 }
 0xcb3   :  { %2396 = vmatpush3.bf16.msra.mxu0 %v1208_v6  ;;  %2397 = vmatprep.mubr.msk.bf16.mxu0 %vm2897_vm1, %v2896_v15  ;;  %v3334_v6 = vld [vmem:[%s3056_s20 + $0x20] sm:$0xff]  }
 0xcb4   :  { %2401 = vmatprep.subr.bf16.mxu0 %v2896_v15 }
 0xcba   :  { %2398 = vmatmul.mubr.msk.bf16.vlgmr.msra.gmra.mrb[32].mxu0 %vm368_vm3, %v1334_v16  ;;  %v1638_v16 = vsub.s32 3, %v1637_v54 }
 0xcbb   :  { %2405 = vmatprep.mubr.msk.bf16.mxu0 %vm2897_vm1, %v2896_v15  ;;  %2402 = vmatpush3.bf16.msra.mxu0 %v2618_v41 }
 0xcbc   :  { %2403 = vmatprep.subr.bf16.mxu0 %v2896_v15 }
 0xcbf   :  { %2404 = vmatpush3.bf16.msra.mxu0 %v2620_v30 }
 0xcc0   :  { %2417 = vmatprep.subr.bf16.mxu0 %v2896_v15 }
 0xd85   :  { %v1314_v18 = vpop.f32.mrb[28].mxu0 }
 0xd86   :  { %v1315_v19 = vadd.f32 %v2163_v17, %v1314_v18  ;;  %v2393_v20 = vpop.f32.mrb[29].mxu0  ;;  %v2174_v17 = vld [vmem:[%s3051_s6] ss:$0 sm:$0xff]  ;;  %s2912_s6 = smov [#allocation13]  }
 0xd87   :  { %v1317_v21 = vpop.f32.mrb[30].mxu0  ;;  %s2086_s20 = sshll.u32 %s2912_s6, 4  ;;  %s2087_s20 = int_to_ptr.vmem [resolvable:$true] %s2086_s20 }
 0xd88   :  { %v2394_v22 = vpop.f32.mrb[31].mxu0  ;;  %v1320_v23 = vmul.f32 %v1315_v19, %v1315_v19  ;;  %p2834_p7 = scmp.lt.s32.totalorder %s2087_s20, %s2087_s20 }
 0xd8a   :  { %v1321_v24 = vsel %vm200_vm0, %v1320_v23, 0.0 }
 0xd8b   :  { %1322 = vadd.xlane.f32.xlu0 %v1321_v24 }
 0xd8d   :  { %v1372_v27 = vpop.f32.mrb[32].mxu0 }
 0xd8e   :  { %v2399_v28 = vpop.f32.mrb[33].mxu0  ;;  %v1387_v33 = vpack.c.bf16 %v1372_v27, %v1372_v27 }
 0xd8f   :  { %v1375_v0 = vpop.f32.mrb[34].mxu0 }
 0xd90   :  { %v2400_v32 = vpop.f32.mrb[35].mxu0  ;;  %2406 = vmatmul.mubr.msk.bf16.vlgmr.msra.gmra.mrb[36].mxu0 %vm200_vm0, %v1387_v33 }
 0xd91   :  { %2419 = vmatprep.mubr.msk.bf16.mxu0 %vm2897_vm1, %v2896_v15  ;;  %2418 = vmatpush3.bf16.msra.mxu0 %v2623_v34 }
 0xd92   :  { %2431 = vmatprep.subr.bf16.mxu0 %v2896_v15 }
 0xd98   :  { %2420 = vmatmul.mubr.msk.bf16.vlgmr.msra.gmra.mrb[40].mxu0 %vm368_vm3, %v1506_v35 }
 0xd99   :  { %2447 = vmatprep.mubr.msk.bf16.mxu0 %vm2897_vm1, %v2896_v15  ;;  %2432 = vmatpush3.bf16.msra.mxu0 %v3309_v61 }
 0xd9a   :  { %2433 = vmatprep.subr.bf16.mxu0 %v2896_v15 }
 0xd9d   :  { %2434 = vmatpush3.bf16.msra.mxu0 %v3320_v3 }
 0xd9e   :  { %2435 = vmatprep.subr.bf16.mxu0 %v2896_v15 }
 0xda1   :  { %2436 = vmatpush3.bf16.msra.mxu0 %v3325_v4 }
 0xda2   :  { %2437 = vmatprep.subr.bf16.mxu0 %v2896_v15 }
 0xda5   :  { %2438 = vmatpush3.bf16.msra.mxu0 %v3330_v5 }
 0xda6   :  { %2439 = vmatprep.subr.bf16.mxu0 %v2896_v15 }
 0xda9   :  { %2440 = vmatpush3.bf16.msra.mxu0 %v3334_v6 }
 0xdaa   :  { %2441 = vmatprep.subr.bf16.mxu0 %v2896_v15 }
 0xdad   :  { %2442 = vmatpush3.bf16.msra.mxu0 %v3339_v7 }
 0xdae   :  { %2443 = vmatprep.subr.bf16.mxu0 %v2896_v15 }
 0xdb1   :  { %2444 = vmatpush3.bf16.msra.mxu0 %v3344_v8 }
 0xdb2   :  { %2445 = vmatprep.subr.bf16.mxu0 %v2896_v15 }
 0xdb5   :  { %2446 = vmatpush3.bf16.msra.mxu0 %v3349_v9 }
 0xdb6   :  { %2479 = vmatprep.subr.bf16.mxu0 %v2896_v15 }
 0xe18   :  { %v1323_v1 = vpop.xlane.xlu0 %1322 }
 0xe19   :  { %2681 = vrsqrt.f32 %v1323_v1  ;;  %vm1326_vm5 = vcmp.eq.f32.partialorder %v1323_v1, inf  ;;  %v1329_v38 = vand.u32 2147483648, %v1323_v1  ;;  %vm1328_vm6 = vcmp.eq.f32.partialorder %v1323_v1, 0.0 }
 0xe23   :  { %v2682_v36 = vpop.eup %2681 }
 0xe24   :  { %v1325_v37 = vmul.f32 %v2682_v36, %v1323_v1 }
 0xe26   :  { %v1327_v39 = vsel %vm1326_vm5, %v1323_v1, %v1325_v37  ;;  %v3365_v1 = vld [vmem:[%s3061_s27] ss:$0 sm:$0xff]  ;;  %s2829_s27 = scalar_lea.vmem %s2087_s20, 128 }
 0xe27   :  { %v1330_v40 = vsel %vm1328_vm6, %v1329_v38, %v1327_v39  ;;  %p2830_p6 = scmp.ne.s32.totalorder %s2087_s20, %s2829_s27  ;;  %p2835_p8 = scmp.lt.s32.totalorder %s2829_s27, %s2829_s27 }
 0xe28   :  { %v1331_v42 = vadd.f32 1e-08, %v1330_v40 }
 0xe29   :  { %p2836_p9 = por %p2835_p8, %p2834_p7 }
 0xe2a   :  { %2683 = vrcp.f32 %v1331_v42 }
 0xe2b   :  { %p2837_p10 = pnand %p2836_p9, %p2830_p6 }
 0xe34   :  { %v2684_v43 = vpop.eup %2683 }
 0xe35   :  { %v1333_v44 = vmul.f32 %v2684_v43, %v1315_v19 }
 0xe37   :  { %v1382_v46 = vpack.c.bf16 %v1333_v44, %v1333_v44 }
 0xe39   :  { %2414 = vmatmul.mubr.msk.bf16.vlgmr.msra.gmra.mrb[24].mxu1 %vm200_vm0, %v1382_v46 }
 0xe3a   :  { %2424 = vmatpush3.bf16.msra.mxu1 %v3284_v45  ;;  %2427 = vmatprep.mubr.msk.bf16.mxu1 %vm2897_vm1, %v2896_v15 }
 0xe3b   :  { %2425 = vmatprep.subr.bf16.mxu1 %v2896_v15 }
 0xe3e   :  { %2426 = vmatpush3.bf16.msra.mxu1 %v3289_v47 }
 0xe3f   :  { %2451 = vmatprep.subr.bf16.mxu1 %v2896_v15 }
 0xe41   :  { %2428 = vmatmul.mubr.msk.bf16.vlgmr.msra.gmra.mrb[28].mxu1 %vm200_vm0, %v1580_v49 }
 0xe42   :  { %2452 = vmatpush3.bf16.msra.mxu1 %v3284_v45  ;;  %2455 = vmatprep.mubr.msk.bf16.mxu1 %vm2897_vm1, %v2896_v15 }
 0xe43   :  { %2453 = vmatprep.subr.bf16.mxu1 %v2896_v15 }
 0xe46   :  { %2454 = vmatpush3.bf16.msra.mxu1 %v3289_v47 }
 0xe47   :  { %2459 = vmatprep.subr.bf16.mxu1 %v2896_v15 }
 0xe63   :  { %v1437_v26 = vpop.f32.mrb[36].mxu0 }
 0xe64   :  { %v2407_v50 = vpop.f32.mrb[37].mxu0 }
 0xe65   :  { %v1440_v29 = vpop.f32.mrb[38].mxu0 }
 0xe66   :  { %v2408_v51 = vpop.f32.mrb[39].mxu0 }
 0xe6b   :  { %v1552_v53 = vpop.f32.mrb[40].mxu0 }
 0xe6c   :  { %v2421_v55 = vpop.f32.mrb[41].mxu0  ;;  %v3311_v62 = vrot.slane %v1552_v53, %v1797_v57  ;;  %v3313_v63 = vrot.slane %v1552_v53, %v1902_v58  ;;  %v3315_v2 = vrot.slane %v1552_v53, %v2007_v59  ;;  %v1639_v19 = vrot.slane %v1552_v53, %v1638_v16 }
 0xe6d   :  { %v1555_v56 = vpop.f32.mrb[42].mxu0 }
 0xe6e   :  { %v2422_v60 = vpop.f32.mrb[43].mxu0 }
 0xf0c   :  { %v1492_v10 = vpop.f32.mrb[24].mxu1 }
 0xf0d   :  { %v1493_v11 = vadd.f32 %v1492_v10, %v1437_v26  ;;  %v2415_v12 = vpop.f32.mrb[25].mxu1 }
 0xf0e   :  { %v1495_v13 = vpop.f32.mrb[26].mxu1 }
 0xf0f   :  { %v2416_v14 = vpop.f32.mrb[27].mxu1  ;;  %v3355_v18 = vadd.f32 %v2174_v17, %v1493_v11 }
 0xf14   :  { %v1630_v20 = vpop.f32.mrb[28].mxu1 }
 0xf15   :  { %v1631_v21 = vadd.f32 %v1630_v20, %v3355_v18  ;;  %v2429_v22 = vpop.f32.mrb[29].mxu1 }
 0xf16   :  { %v1633_v23 = vpop.f32.mrb[30].mxu1 }
 0xf17   :  { %v1640_v24 = vadd.f32 %v1639_v19, %v1631_v21  ;;  %v2430_v41 = vpop.f32.mrb[31].mxu1 }
 0xf19   :  { %v1641_v25 = vmul.f32 %v1640_v24, %v1640_v24 }
 0xf1b   :  { %v1642_v27 = vmul.f32 %v1641_v25, %v1640_v24 }
 0xf1d   :  { %v1643_v28 = vmul.f32 0.044715, %v1642_v27 }
 0xf1f   :  { %v1644_v30 = vadd.f32 %v1643_v28, %v1640_v24 }
 0xf21   :  { %v1645_v31 = vmul.f32 0.7978846, %v1644_v30 }
 0xf23   :  { %2685 = vtanh.f32 %v1645_v31 }
 0xf2d   :  { %v2686_v0 = vpop.eup %2685 }
 0xf2e   :  { %v1647_v32 = vadd.f32 1.0, %v2686_v0 }
 0xf30   :  { %v1648_v33 = vmul.f32 0.5, %v1647_v32 }
 0xf32   :  { %v1649_v34 = vmul.f32 %v1648_v33, %v1640_v24 }
 0xf34   :  { %v1650_v35 = vpack.c.bf16 %v1649_v34, %v1649_v34 }
 0xf36   :  { %2448 = vmatmul.mubr.bf16.vlgmr.msra.gmra.mrb[44].mxu0 %v1650_v35 }
 0xf37   :  { %2480 = vmatpush3.bf16.msra.mxu0 %v3284_v45  ;;  %2483 = vmatprep.mubr.msk.bf16.mxu0 %vm2897_vm1, %v2896_v15 }
 0xf38   :  { %2481 = vmatprep.subr.bf16.mxu0 %v2896_v15 }
 0xf3b   :  { %2482 = vmatpush3.bf16.msra.mxu0 %v3289_v47 }
 0xf3c   :  { %2487 = vmatprep.subr.bf16.mxu0 %v2896_v15 }
0x1009   :  { %v1739_v36 = vpop.f32.mrb[44].mxu0 }
0x100a   :  { %v1740_v37 = vadd.f32 %v3365_v1, %v1739_v36  ;;  %v2449_v38 = vpop.f32.mrb[45].mxu0 }
0x100b   :  { %v1742_v39 = vpop.f32.mrb[46].mxu0 }
0x100c   :  { %v1745_v40 = vmul.f32 0.0784591, %v1740_v37  ;;  %v2450_v42 = vpop.f32.mrb[47].mxu0  ;;  %v1748_v46 = vmul.f32 0.52249855, %v1740_v37 }
0x100e   :  { %v1746_v43 = vsub.f32 %v3294_v48, %v1745_v40 }
0x1010   :  { %v1747_v44 = vmul.f32 1.0030922, %v1746_v43 }
0x1012   :  { %v1749_v49 = vmul.f32 0.85264015, %v1747_v44 }
0x1014   :  { %v1750_v26 = vadd.f32 %v1749_v49, %v1748_v46 }
0x1016   :  { %v1751_v50 = vpack.c.bf16 %v1750_v26, %v1750_v26 }
0x1018   :  { %2456 = vmatmul.mubr.msk.bf16.vlgmr.msra.gmra.mrb[32].mxu1 %vm200_vm0, %v1751_v50 }
0x1019   :  { %2460 = vmatpush3.bf16.msra.mxu1 %v3309_v61  ;;  %2475 = vmatprep.mubr.msk.bf16.mxu1 %vm2897_vm1, %v2896_v15 }
0x101a   :  { %2461 = vmatprep.subr.bf16.mxu1 %v2896_v15 }
0x101d   :  { %2462 = vmatpush3.bf16.msra.mxu1 %v3320_v3 }
0x101e   :  { %2463 = vmatprep.subr.bf16.mxu1 %v2896_v15 }
0x1021   :  { %2464 = vmatpush3.bf16.msra.mxu1 %v3325_v4 }
0x1022   :  { %2465 = vmatprep.subr.bf16.mxu1 %v2896_v15 }
0x1025   :  { %2466 = vmatpush3.bf16.msra.mxu1 %v3330_v5 }
0x1026   :  { %2467 = vmatprep.subr.bf16.mxu1 %v2896_v15 }
0x1029   :  { %2468 = vmatpush3.bf16.msra.mxu1 %v3334_v6 }
0x102a   :  { %2469 = vmatprep.subr.bf16.mxu1 %v2896_v15 }
0x102d   :  { %2470 = vmatpush3.bf16.msra.mxu1 %v3339_v7 }
0x102e   :  { %2471 = vmatprep.subr.bf16.mxu1 %v2896_v15 }
0x1031   :  { %2472 = vmatpush3.bf16.msra.mxu1 %v3344_v8 }
0x1032   :  { %2473 = vmatprep.subr.bf16.mxu1 %v2896_v15 }
0x1035   :  { %2474 = vmatpush3.bf16.msra.mxu1 %v3349_v9 }
0x1036   :  { %2507 = vmatprep.subr.bf16.mxu1 %v2896_v15 }
0x10eb   :  { %v1789_v48 = vpop.f32.mrb[32].mxu1 }
0x10ec   :  { %v1790_v29 = vadd.f32 %v1789_v48, %v3355_v18  ;;  %v2457_v51 = vpop.f32.mrb[33].mxu1 }
0x10ed   :  { %v1792_v52 = vpop.f32.mrb[34].mxu1 }
0x10ee   :  { %v1799_v53 = vadd.f32 %v3311_v62, %v1790_v29  ;;  %v2458_v54 = vpop.f32.mrb[35].mxu1 }
0x10f0   :  { %v1800_v55 = vmul.f32 %v1799_v53, %v1799_v53 }
0x10f2   :  { %v1801_v56 = vmul.f32 %v1800_v55, %v1799_v53 }
0x10f4   :  { %v1802_v57 = vmul.f32 0.044715, %v1801_v56 }
0x10f6   :  { %v1803_v58 = vadd.f32 %v1802_v57, %v1799_v53 }
0x10f8   :  { %v1804_v59 = vmul.f32 0.7978846, %v1803_v58 }
0x10fa   :  { %2687 = vtanh.f32 %v1804_v59 }
0x1104   :  { %v2688_v60 = vpop.eup %2687 }
0x1105   :  { %v1806_v10 = vadd.f32 1.0, %v2688_v60 }
0x1107   :  { %v1807_v11 = vmul.f32 0.5, %v1806_v10 }
0x1109   :  { %v1808_v12 = vmul.f32 %v1807_v11, %v1799_v53 }
0x110b   :  { %v1809_v13 = vpack.c.bf16 %v1808_v12, %v1808_v12 }
0x110d   :  { %2476 = vmatmul.mubr.bf16.vlgmr.msra.gmra.mrb[36].mxu1 %v1809_v13 }
0x110e   :  { %2508 = vmatpush3.bf16.msra.mxu1 %v3284_v45  ;;  %2511 = vmatprep.mubr.msk.bf16.mxu1 %vm2897_vm1, %v2896_v15 }
0x110f   :  { %2509 = vmatprep.subr.bf16.mxu1 %v2896_v15 }
0x1112   :  { %2510 = vmatpush3.bf16.msra.mxu1 %v3289_v47 }
0x1113   :  { %2515 = vmatprep.subr.bf16.mxu1 %v2896_v15 }
0x11e0   :  { %v1844_v62 = vpop.f32.mrb[36].mxu1 }
0x11e1   :  { %v1845_v14 = vadd.f32 %v3365_v1, %v1844_v62  ;;  %v2477_v16 = vpop.f32.mrb[37].mxu1 }
0x11e2   :  { %v1847_v17 = vpop.f32.mrb[38].mxu1 }
0x11e3   :  { %v1850_v19 = vmul.f32 0.52249855, %v1845_v14  ;;  %v2478_v20 = vpop.f32.mrb[39].mxu1  ;;  %v1853_v23 = vmul.f32 0.85264015, %v1845_v14 }
0x11e5   :  { %v1851_v21 = vsub.f32 %v1750_v26, %v1850_v19 }
0x11e7   :  { %v1852_v22 = vmul.f32 1.1728277, %v1851_v21 }
0x11e9   :  { %v1854_v45 = vmul.f32 0.52249855, %v1852_v22 }
0x11eb   :  { %v1855_v24 = vadd.f32 %v1854_v45, %v1853_v23 }
0x11ed   :  { %v1856_v41 = vpack.c.bf16 %v1855_v24, %v1855_v24 }
0x11ef   :  { %2484 = vmatmul.mubr.msk.bf16.vlgmr.msra.gmra.mrb[48].mxu0 %vm200_vm0, %v1856_v41 }
0x11f0   :  { %2488 = vmatpush3.bf16.msra.mxu0 %v3309_v61  ;;  %2503 = vmatprep.mubr.msk.bf16.mxu0 %vm2897_vm1, %v2896_v15 }
0x11f1   :  { %2489 = vmatprep.subr.bf16.mxu0 %v2896_v15 }
0x11f4   :  { %2490 = vmatpush3.bf16.msra.mxu0 %v3320_v3 }
0x11f5   :  { %2491 = vmatprep.subr.bf16.mxu0 %v2896_v15 }
0x11f8   :  { %2492 = vmatpush3.bf16.msra.mxu0 %v3325_v4 }
0x11f9   :  { %2493 = vmatprep.subr.bf16.mxu0 %v2896_v15 }
0x11fc   :  { %2494 = vmatpush3.bf16.msra.mxu0 %v3330_v5 }
0x11fd   :  { %2495 = vmatprep.subr.bf16.mxu0 %v2896_v15 }
0x1200   :  { %2496 = vmatpush3.bf16.msra.mxu0 %v3334_v6 }
0x1201   :  { %2497 = vmatprep.subr.bf16.mxu0 %v2896_v15 }
0x1204   :  { %2498 = vmatpush3.bf16.msra.mxu0 %v3339_v7 }
0x1205   :  { %2499 = vmatprep.subr.bf16.mxu0 %v2896_v15 }
0x1208   :  { %2500 = vmatpush3.bf16.msra.mxu0 %v3344_v8 }
0x1209   :  { %2501 = vmatprep.subr.bf16.mxu0 %v2896_v15 }
0x120c   :  { %2502 = vmatpush3.bf16.msra.mxu0 %v3349_v9 }
0x12c2   :  { %v1894_v47 = vpop.f32.mrb[48].mxu0 }
0x12c3   :  { %v1895_v25 = vadd.f32 %v1894_v47, %v3355_v18  ;;  %v2485_v27 = vpop.f32.mrb[49].mxu0 }
0x12c4   :  { %v1897_v28 = vpop.f32.mrb[50].mxu0 }
0x12c5   :  { %v1904_v30 = vadd.f32 %v3313_v63, %v1895_v25  ;;  %v2486_v31 = vpop.f32.mrb[51].mxu0 }
0x12c7   :  { %v1905_v0 = vmul.f32 %v1904_v30, %v1904_v30 }
0x12c9   :  { %v1906_v32 = vmul.f32 %v1905_v0, %v1904_v30 }
0x12cb   :  { %v1907_v33 = vmul.f32 0.044715, %v1906_v32 }
0x12cd   :  { %v1908_v34 = vadd.f32 %v1907_v33, %v1904_v30 }
0x12cf   :  { %v1909_v35 = vmul.f32 0.7978846, %v1908_v34 }
0x12d1   :  { %2689 = vtanh.f32 %v1909_v35 }
0x12db   :  { %v2690_v36 = vpop.eup %2689 }
0x12dc   :  { %v1911_v37 = vadd.f32 1.0, %v2690_v36 }
0x12de   :  { %v1912_v38 = vmul.f32 0.5, %v1911_v37 }
0x12e0   :  { %v1913_v39 = vmul.f32 %v1912_v38, %v1904_v30 }
0x12e2   :  { %v1914_v40 = vpack.c.bf16 %v1913_v39, %v1913_v39 }
0x12e4   :  { %2504 = vmatmul.mubr.bf16.vlgmr.msra.gmra.mrb[52].mxu0 %v1914_v40 }
0x13b7   :  { %v1949_v42 = vpop.f32.mrb[52].mxu0 }
0x13b8   :  { %v1950_v43 = vadd.f32 %v3365_v1, %v1949_v42  ;;  %v2505_v44 = vpop.f32.mrb[53].mxu0 }
0x13b9   :  { %v1952_v46 = vpop.f32.mrb[54].mxu0 }
0x13ba   :  { %v1955_v49 = vmul.f32 0.85264015, %v1950_v43  ;;  %v2506_v63 = vpop.f32.mrb[55].mxu0  ;;  %v1958_v48 = vmul.f32 0.9969173, %v1950_v43 }
0x13bc   :  { %v1956_v26 = vsub.f32 %v1855_v24, %v1955_v49 }
0x13be   :  { %v1957_v50 = vmul.f32 1.9138808, %v1956_v26 }
0x13c0   :  { %v1959_v29 = vmul.f32 0.0784591, %v1957_v50 }
0x13c2   :  { %v1960_v51 = vadd.f32 %v1959_v29, %v1958_v48 }
0x13c4   :  { %v1961_v52 = vpack.c.bf16 %v1960_v51, %v1960_v51 }
0x13c6   :  { %2512 = vmatmul.mubr.msk.bf16.vlgmr.msra.gmra.mrb[40].mxu1 %vm200_vm0, %v1961_v52 }
0x13c7   :  { %2516 = vmatpush3.bf16.msra.mxu1 %v3309_v61  ;;  %2531 = vmatprep.mubr.msk.bf16.mxu1 %vm2897_vm1, %v2896_v15 }
0x13c8   :  { %2517 = vmatprep.subr.bf16.mxu1 %v2896_v15 }
0x13cb   :  { %2518 = vmatpush3.bf16.msra.mxu1 %v3320_v3 }
0x13cc   :  { %2519 = vmatprep.subr.bf16.mxu1 %v2896_v15 }
0x13cf   :  { %2520 = vmatpush3.bf16.msra.mxu1 %v3325_v4 }
0x13d0   :  { %2521 = vmatprep.subr.bf16.mxu1 %v2896_v15 }
0x13d3   :  { %2522 = vmatpush3.bf16.msra.mxu1 %v3330_v5 }
0x13d4   :  { %2523 = vmatprep.subr.bf16.mxu1 %v2896_v15 }
0x13d7   :  { %2524 = vmatpush3.bf16.msra.mxu1 %v3334_v6 }
0x13d8   :  { %2525 = vmatprep.subr.bf16.mxu1 %v2896_v15 }
0x13db   :  { %2526 = vmatpush3.bf16.msra.mxu1 %v3339_v7 }
0x13dc   :  { %2527 = vmatprep.subr.bf16.mxu1 %v2896_v15 }
0x13df   :  { %2528 = vmatpush3.bf16.msra.mxu1 %v3344_v8 }
0x13e0   :  { %2529 = vmatprep.subr.bf16.mxu1 %v2896_v15 }
0x13e3   :  { %2530 = vmatpush3.bf16.msra.mxu1 %v3349_v9 }
0x1499   :  { %v1999_v61 = vpop.f32.mrb[40].mxu1 }
0x149a   :  { %v2000_v3 = vadd.f32 %v1999_v61, %v3355_v18  ;;  %v2513_v4 = vpop.f32.mrb[41].mxu1 }
0x149b   :  { %v2002_v5 = vpop.f32.mrb[42].mxu1 }
0x149c   :  { %v2009_v53 = vadd.f32 %v3315_v2, %v2000_v3  ;;  %v2514_v6 = vpop.f32.mrb[43].mxu1 }
0x149e   :  { %v2010_v54 = vmul.f32 %v2009_v53, %v2009_v53 }
0x14a0   :  { %v2011_v55 = vmul.f32 %v2010_v54, %v2009_v53 }
0x14a2   :  { %v2012_v56 = vmul.f32 0.044715, %v2011_v55 }
0x14a4   :  { %v2013_v7 = vadd.f32 %v2012_v56, %v2009_v53 }
0x14a6   :  { %v2014_v57 = vmul.f32 0.7978846, %v2013_v7 }
0x14a8   :  { %2691 = vtanh.f32 %v2014_v57 }
0x14b2   :  { %v2692_v58 = vpop.eup %2691 }
0x14b3   :  { %v2016_v8 = vadd.f32 1.0, %v2692_v58 }
0x14b5   :  { %v2017_v59 = vmul.f32 0.5, %v2016_v8 }
0x14b7   :  { %v2018_v15 = vmul.f32 %v2017_v59, %v2009_v53 }
0x14b9   :  { %v2019_v60 = vpack.c.bf16 %v2018_v15, %v2018_v15 }
0x14bb   :  { %2532 = vmatmul.mubr.bf16.vlgmr.msra.gmra.mrb[44].mxu1 %v2019_v60 }
0x158e   :  { %v2054_v9 = vpop.f32.mrb[44].mxu1 }
0x158f   :  { %v2055_v18 = vadd.f32 %v3365_v1, %v2054_v9  ;;  %v2533_v10 = vpop.f32.mrb[45].mxu1 }
0x1590   :  { %v2057_v11 = vpop.f32.mrb[46].mxu1 }
0x1591   :  { %v2060_v12 = vmul.f32 0.9969173, %v2055_v18  ;;  %v2534_v2 = vpop.f32.mrb[47].mxu1 }
0x1593   :  { %v2061_v13 = vsub.f32 %v1960_v51, %v2060_v12 }
0x1595   :  { %v2062_v62 = vmul.f32 12.745495, %v2061_v13 }
0x1597   :  { %v2063_v14 = vmul.f32 0.0, %v2062_v62 }
0x1599   :  { %v2064_v16 = vadd.f32 %v2063_v14, %v2055_v18 }
0x159b   :  { %v2065_v17 = vmul.f32 %v2064_v16, %v2064_v16 }
0x159d   :  { %v2066_v19 = vsel %vm200_vm0, %v2065_v17, 0.0 }
0x159e   :  { %2067 = vadd.xlane.f32.xlu1 %v2066_v19 }
0x162b   :  { %v2068_v20 = vpop.xlane.xlu1 %2067 }
0x162c   :  { %2693 = vrsqrt.f32 %v2068_v20  ;;  %vm2071_vm7 = vcmp.eq.f32.partialorder %v2068_v20, inf  ;;  %v2074_v23 = vand.u32 2147483648, %v2068_v20  ;;  %vm2073_vm8 = vcmp.eq.f32.partialorder %v2068_v20, 0.0 }
0x1636   :  { %v2694_v21 = vpop.eup %2693 }
0x1637   :  { %v2070_v22 = vmul.f32 %v2694_v21, %v2068_v20 }
0x1639   :  { %v2072_v45 = vsel %vm2071_vm7, %v2068_v20, %v2070_v22 }
0x163a   :  { %v2075_v1 = vsel %vm2073_vm8, %v2074_v23, %v2072_v45 }
0x163b   :  { %v2076_v24 = vadd.f32 1e-08, %v2075_v1 }
0x163d   :  { %2695 = vrcp.f32 %v2076_v24 }
0x1647   :  { %v2696_v41 = vpop.eup %2695 }
0x1648   :  { %v2078_v47 = vmul.f32 %v2696_v41, %v2064_v16 }
0x164a   :  { %2079 = vst.msk [vmem:[#allocation13] sm:$0xff] %vm200_vm0, %v2078_v47 }
0x164b   :  { %2840 = shalt.err (!%p2837_p10)
}
0x164c   :  { %s2841_s17 = scalar_lea.hbm %s3066_s4, 128 }
0x164d   :  { %p2842_p11 = scmp.ne.s32.totalorder %s3066_s4, %s2841_s17  ;;  %p2845_p12 = scmp.lt.u32.totalorder %s2841_s17, %s3066_s4 }
0x164f   :  { %p2847_p13 = pnand %p2845_p12, %p2842_p11 }
0x1651   :  { %2850 = shalt.err (!%p2847_p13)
}
0x1652   :  { %2089 = dma.vmem_to_hbm [thread:$0]  %s2087_s20, 128, %s3066_s4, [#allocation4]  }
0x1653   :  { %2859 = dma.done.wait [#allocation4], 128  }
0x1654   :  { %2860 = vsyncadd [#allocation4], 4294967168 }
0x1655   :  { %2093 = vsyncpa [#allocation3], 1 }
0x1656   :  { %2094 = vsyncpa [#allocation6], 1 }
0x1657   :  { %2095 = vsyncpa [#allocation9], 1 }
0x1658   :  { %2096 = vsyncpa [#allocation12], 1 }
0x1659   :  { %2097 = vsyncpa [#allocation4], 1 }

</bundles_post_ra>
